<compile_context>
chip_gen: v5e
topology: v5e:2x2
jax: 0.10.0
libtpu: 0.0.40
codegen_flags: <defaults>
</compile_context>

<pallas_src>
import functools
import itertools
import math

import jax
import jax.numpy as jnp
import numpy as np
from jax.experimental import pallas as pl
from jax.experimental.pallas import tpu as pltpu

_LANE = 128


def _monomial_index_map(variable_nums: int, basis_order: int):
    """Map each monomial index-tuple to its Theta column index (PyTorch order).

    The PyTorch nested loops enumerate, per degree d, exactly
    itertools.combinations_with_replacement(range(V), d) in lexicographic order,
    with degrees listed in increasing order after the constant column.
    """
    if basis_order < 1 or basis_order > 5:
        raise ValueError("OdeNet reference module only supports 1 <= basis_order <= 5")
    mons = [()]  # constant term
    for d in range(1, basis_order + 1):
        mons.extend(itertools.combinations_with_replacement(range(variable_nums), d))
    return {m: k for k, m in enumerate(mons)}


def _odenet_kernel(vc_ref, x_ref, out_ref, *, col_index, variable_nums, ode_nums,
                   basis_order):
    # vc_ref : (T*N,) f32 in SMEM   (row-major: vc[k, n] -> vc_ref[k*N + n])
    # x_ref  : (V, tile_sub, 128) f32 in VMEM  -- batch on (sublane, lane)
    # out_ref: (N, tile_sub, 128) f32 in VMEM
    V = variable_nums
    N = ode_nums
    tile_shape = (x_ref.shape[1], x_ref.shape[2])

    # Lane+sublane-dense variable slabs, loaded once.
    xs = [x_ref[i] for i in range(V)]

    # One accumulator per output dim; constant term folded into the init
    # (scalar broadcast from SMEM -> no explicit ones-column multiply).
    acc = [jnp.full(tile_shape, vc_ref[n], dtype=jnp.float32) for n in range(N)]

    def accumulate(col, idxs):
        k = col_index[idxs]
        for n in range(N):
            # scalar-from-SMEM times dense slab, N independent accumulator chains
            acc[n] = acc[n] + col * vc_ref[k * N + n]

    def visit(prefix_col, prefix_idxs, start_var):
        # Depth-first monomial enumeration: extend the current prefix column by
        # one variable at a time. Only one live column per degree level.
        for v in range(start_var, V):
            idxs = prefix_idxs + (v,)
            col = xs[v] if prefix_col is None else prefix_col * xs[v]
            accumulate(col, idxs)
            if len(idxs) < basis_order:
                visit(col, idxs, v)

    visit(None, (), 0)  # statically unrolled (Python recursion at trace time)

    for n in range(N):
        out_ref[n] = acc[n]


def _odenet_forward_impl(t, x_input, vc, *, variable_nums, basis_order,
                         max_tile_sub=512):
    """Pallas implementation of OdeNet.forward. `t` is unused (as in the reference)."""
    del t
    col_index = _monomial_index_map(variable_nums, basis_order)
    total_basis = len(col_index)
    assert vc.shape[0] == total_basis, "vc rows must equal the number of basis functions"

    is_3d = (x_input.ndim == 3)
    # NOTE: like the reference, only channel 0 of the middle dim is used for 3-D input.
    x2d = x_input[:, 0, :] if is_3d else x_input  # (B, V)
    B, V = x2d.shape
    assert V == variable_nums
    N = vc.shape[1]

    # Batch tiling: run the whole (padded) batch in ONE grid step whenever it
    # fits in max_tile_sub sublane rows; otherwise tile with max_tile_sub rows
    # per step (still < 4 MiB double-buffered VMEM at 512 rows).
    max_tile_sub = max(8, (int(max_tile_sub) // 8) * 8)
    b_sub_needed = pl.cdiv(max(B, 1), _LANE)
    if b_sub_needed <= max_tile_sub:
        tile_sub = max(8, ((b_sub_needed + 7) // 8) * 8)
    else:
        tile_sub = max_tile_sub
    tile_elems = tile_sub * _LANE
    num_tiles = pl.cdiv(B, tile_elems)
    b_pad = num_tiles * tile_elems
    b_sub = b_pad // _LANE

    xf = x2d.astype(jnp.float32)  # no-op if already f32
    if b_pad != B:
        xf = jnp.pad(xf, ((0, b_pad - B), (0, 0)))
    # (B_pad, V) -> (V, B_sub, 128): batch element b lives at (b // 128, b % 128).
    # TODO(synk): if the surrounding ODE solver keeps activations in this
    # (V, B_sub, 128) layout across steps, this transpose (and the inverse one
    # below) disappears entirely; here it is at least fused under the same jit.
    x3 = xf.T.reshape(V, b_sub, _LANE)

    vc_flat = vc.astype(jnp.float32).reshape(-1)  # (T*N,) row-major, lives in SMEM

    kernel = functools.partial(
        _odenet_kernel, col_index=col_index, variable_nums=V, ode_nums=N,
        basis_order=basis_order)

    out3 = pl.pallas_call(
        kernel,
        out_shape=jax.ShapeDtypeStruct((N, b_sub, _LANE), jnp.float32),
        grid=(num_tiles,),
        in_specs=[
            pl.BlockSpec(memory_space=pltpu.MemorySpace.SMEM),        # vc scalars
            pl.BlockSpec((V, tile_sub, _LANE), lambda i: (0, i, 0)),  # x batch tile
        ],
        out_specs=pl.BlockSpec((N, tile_sub, _LANE), lambda i: (0, i, 0)),
        compiler_params=pltpu.CompilerParams(
            dimension_semantics=("parallel",)),
    )(vc_flat, x3)

    # Padded rows evaluate to the constant term vc[0, :]; the [:B] slice removes
    # them (do not drop this slice when refactoring the output layout).
    out2d = out3.reshape(N, b_pad).T[:B]  # (B, N)
    return out2d[:, None, :] if is_3d else out2d


# Fuse the layout plumbing with the pallas_call in one XLA program.
odenet_forward = jax.jit(
    _odenet_forward_impl,
    static_argnames=("variable_nums", "basis_order", "max_tile_sub"))


def _reference_forward(x_input, vc, *, variable_nums, basis_order):
    """Pure-JAX reference (Theta @ vc) for correctness checking."""
    col_index = _monomial_index_map(variable_nums, basis_order)
    mons = sorted(col_index, key=col_index.get)
    x2d = x_input[:, 0, :] if x_input.ndim == 3 else x_input
    cols = []
    for idxs in mons:
        if len(idxs) == 0:
            cols.append(jnp.ones((x2d.shape[0],), jnp.float32))
        else:
            c = x2d[:, idxs[0]]
            for i in idxs[1:]:
                c = c * x2d[:, i]
            cols.append(c)
    theta = jnp.stack(cols, axis=1)
    out = theta @ vc
    return out[:, None, :] if x_input.ndim == 3 else out


if __name__ == "__main__":
    # Module hyperparameters (consistent with the PyTorch __init__).
    variable_nums = 4
    ode_nums = 3
    basis_order = 3
    train_size = 2048  # batch B: fits in one 16-sublane-row grid step

    total_basis = math.comb(variable_nums + basis_order, basis_order)  # 35

    key = jax.random.PRNGKey(0)
    k_vc, k_err, k_x = jax.random.split(key, 3)

    # Deterministic parameter init mirroring the PyTorch module.
    vc = jax.random.uniform(k_vc, (total_basis, ode_nums), jnp.float32, -0.3, 0.3)
    vc = vc.at[0, 0].set(1.0)
    vc = vc.at[0, 1].set(-1.0)
    # `err` parameter exists in the module but is not used in forward.
    err = jax.random.uniform(k_err, (train_size, 1, ode_nums), jnp.float32, -0.1, 0.1)
    del err

    # x_input in the 3-D layout (B, 1, V); t is unused by forward.
    x_input = jax.random.normal(k_x, (train_size, 1, variable_nums), jnp.float32)
    t = jnp.zeros((), jnp.float32)

    out = odenet_forward(t, x_input, vc,
                         variable_nums=variable_nums, basis_order=basis_order)
    out = jax.block_until_ready(out)

    ref = _reference_forward(x_input, vc,
                             variable_nums=variable_nums, basis_order=basis_order)
    np.testing.assert_allclose(np.asarray(out), np.asarray(ref), rtol=1e-5, atol=1e-5)
    assert out.shape == (train_size, 1, ode_nums)

    print("KERNEL_OK")
</pallas_src>

<mosaic_0001>
module attributes {stable_mosaic.version = 11 : i64} {
  func.func @_odenet_kernel(%arg0: i32, %arg1: memref<105xf32, #tpu.memory_space<smem>>, %arg2: memref<4x16x128xf32, #tpu.memory_space<vmem>>, %arg3: memref<3x16x128xf32, #tpu.memory_space<vmem>>) attributes {dimension_semantics = [#tpu.dimension_semantics<parallel>], iteration_bounds = array<i64: 1>, scalar_prefetch = 0 : i64, scratch_operands = 0 : i64, tpu.core_type = #tpu.core_type<tc>, window_params = [{transform_indices = @transform_0, window_bounds = array<i64: 105>}, {transform_indices = @transform_1, window_bounds = array<i64: 4, 16, 128>}, {transform_indices = @transform_2, window_bounds = array<i64: 3, 16, 128>}]} {
    %c0 = arith.constant 0 : index
    %c0_0 = arith.constant 0 : index
    %c0_1 = arith.constant 0 : index
    %0 = vector.load %arg2[%c0, %c0_0, %c0_1] : memref<4x16x128xf32, #tpu.memory_space<vmem>>, vector<1x16x128xf32>
    %1 = vector.shape_cast %0 : vector<1x16x128xf32> to vector<16x128xf32>
    %c1 = arith.constant 1 : index
    %c0_2 = arith.constant 0 : index
    %c0_3 = arith.constant 0 : index
    %2 = vector.load %arg2[%c1, %c0_2, %c0_3] : memref<4x16x128xf32, #tpu.memory_space<vmem>>, vector<1x16x128xf32>
    %3 = vector.shape_cast %2 : vector<1x16x128xf32> to vector<16x128xf32>
    %c2 = arith.constant 2 : index
    %c0_4 = arith.constant 0 : index
    %c0_5 = arith.constant 0 : index
    %4 = vector.load %arg2[%c2, %c0_4, %c0_5] : memref<4x16x128xf32, #tpu.memory_space<vmem>>, vector<1x16x128xf32>
    %5 = vector.shape_cast %4 : vector<1x16x128xf32> to vector<16x128xf32>
    %c3 = arith.constant 3 : index
    %c0_6 = arith.constant 0 : index
    %c0_7 = arith.constant 0 : index
    %6 = vector.load %arg2[%c3, %c0_6, %c0_7] : memref<4x16x128xf32, #tpu.memory_space<vmem>>, vector<1x16x128xf32>
    %7 = vector.shape_cast %6 : vector<1x16x128xf32> to vector<16x128xf32>
    %c0_8 = arith.constant 0 : index
    %8 = memref.load %arg1[%c0_8] : memref<105xf32, #tpu.memory_space<smem>>
    %9 = vector.broadcast %8 : f32 to vector<16x128xf32>
    %c1_9 = arith.constant 1 : index
    %10 = memref.load %arg1[%c1_9] : memref<105xf32, #tpu.memory_space<smem>>
    %11 = vector.broadcast %10 : f32 to vector<16x128xf32>
    %c2_10 = arith.constant 2 : index
    %12 = memref.load %arg1[%c2_10] : memref<105xf32, #tpu.memory_space<smem>>
    %13 = vector.broadcast %12 : f32 to vector<16x128xf32>
    %c3_11 = arith.constant 3 : index
    %14 = memref.load %arg1[%c3_11] : memref<105xf32, #tpu.memory_space<smem>>
    %15 = vector.broadcast %14 : f32 to vector<16x128xf32>
    %16 = arith.mulf %1, %15 : vector<16x128xf32>
    %17 = arith.addf %9, %16 : vector<16x128xf32>
    %c4 = arith.constant 4 : index
    %18 = memref.load %arg1[%c4] : memref<105xf32, #tpu.memory_space<smem>>
    %19 = vector.broadcast %18 : f32 to vector<16x128xf32>
    %20 = arith.mulf %1, %19 : vector<16x128xf32>
    %21 = arith.addf %11, %20 : vector<16x128xf32>
    %c5 = arith.constant 5 : index
    %22 = memref.load %arg1[%c5] : memref<105xf32, #tpu.memory_space<smem>>
    %23 = vector.broadcast %22 : f32 to vector<16x128xf32>
    %24 = arith.mulf %1, %23 : vector<16x128xf32>
    %25 = arith.addf %13, %24 : vector<16x128xf32>
    %26 = arith.mulf %1, %1 : vector<16x128xf32>
    %c15 = arith.constant 15 : index
    %27 = memref.load %arg1[%c15] : memref<105xf32, #tpu.memory_space<smem>>
    %28 = vector.broadcast %27 : f32 to vector<16x128xf32>
    %29 = arith.mulf %26, %28 : vector<16x128xf32>
    %30 = arith.addf %17, %29 : vector<16x128xf32>
    %c16 = arith.constant 16 : index
    %31 = memref.load %arg1[%c16] : memref<105xf32, #tpu.memory_space<smem>>
    %32 = vector.broadcast %31 : f32 to vector<16x128xf32>
    %33 = arith.mulf %26, %32 : vector<16x128xf32>
    %34 = arith.addf %21, %33 : vector<16x128xf32>
    %c17 = arith.constant 17 : index
    %35 = memref.load %arg1[%c17] : memref<105xf32, #tpu.memory_space<smem>>
    %36 = vector.broadcast %35 : f32 to vector<16x128xf32>
    %37 = arith.mulf %26, %36 : vector<16x128xf32>
    %38 = arith.addf %25, %37 : vector<16x128xf32>
    %39 = arith.mulf %26, %1 : vector<16x128xf32>
    %c45 = arith.constant 45 : index
    %40 = memref.load %arg1[%c45] : memref<105xf32, #tpu.memory_space<smem>>
    %41 = vector.broadcast %40 : f32 to vector<16x128xf32>
    %42 = arith.mulf %39, %41 : vector<16x128xf32>
    %43 = arith.addf %30, %42 : vector<16x128xf32>
    %c46 = arith.constant 46 : index
    %44 = memref.load %arg1[%c46] : memref<105xf32, #tpu.memory_space<smem>>
    %45 = vector.broadcast %44 : f32 to vector<16x128xf32>
    %46 = arith.mulf %39, %45 : vector<16x128xf32>
    %47 = arith.addf %34, %46 : vector<16x128xf32>
    %c47 = arith.constant 47 : index
    %48 = memref.load %arg1[%c47] : memref<105xf32, #tpu.memory_space<smem>>
    %49 = vector.broadcast %48 : f32 to vector<16x128xf32>
    %50 = arith.mulf %39, %49 : vector<16x128xf32>
    %51 = arith.addf %38, %50 : vector<16x128xf32>
    %52 = arith.mulf %26, %3 : vector<16x128xf32>
    %c48 = arith.constant 48 : index
    %53 = memref.load %arg1[%c48] : memref<105xf32, #tpu.memory_space<smem>>
    %54 = vector.broadcast %53 : f32 to vector<16x128xf32>
    %55 = arith.mulf %52, %54 : vector<16x128xf32>
    %56 = arith.addf %43, %55 : vector<16x128xf32>
    %c49 = arith.constant 49 : index
    %57 = memref.load %arg1[%c49] : memref<105xf32, #tpu.memory_space<smem>>
    %58 = vector.broadcast %57 : f32 to vector<16x128xf32>
    %59 = arith.mulf %52, %58 : vector<16x128xf32>
    %60 = arith.addf %47, %59 : vector<16x128xf32>
    %c50 = arith.constant 50 : index
    %61 = memref.load %arg1[%c50] : memref<105xf32, #tpu.memory_space<smem>>
    %62 = vector.broadcast %61 : f32 to vector<16x128xf32>
    %63 = arith.mulf %52, %62 : vector<16x128xf32>
    %64 = arith.addf %51, %63 : vector<16x128xf32>
    %65 = arith.mulf %26, %5 : vector<16x128xf32>
    %c51 = arith.constant 51 : index
    %66 = memref.load %arg1[%c51] : memref<105xf32, #tpu.memory_space<smem>>
    %67 = vector.broadcast %66 : f32 to vector<16x128xf32>
    %68 = arith.mulf %65, %67 : vector<16x128xf32>
    %69 = arith.addf %56, %68 : vector<16x128xf32>
    %c52 = arith.constant 52 : index
    %70 = memref.load %arg1[%c52] : memref<105xf32, #tpu.memory_space<smem>>
    %71 = vector.broadcast %70 : f32 to vector<16x128xf32>
    %72 = arith.mulf %65, %71 : vector<16x128xf32>
    %73 = arith.addf %60, %72 : vector<16x128xf32>
    %c53 = arith.constant 53 : index
    %74 = memref.load %arg1[%c53] : memref<105xf32, #tpu.memory_space<smem>>
    %75 = vector.broadcast %74 : f32 to vector<16x128xf32>
    %76 = arith.mulf %65, %75 : vector<16x128xf32>
    %77 = arith.addf %64, %76 : vector<16x128xf32>
    %78 = arith.mulf %26, %7 : vector<16x128xf32>
    %c54 = arith.constant 54 : index
    %79 = memref.load %arg1[%c54] : memref<105xf32, #tpu.memory_space<smem>>
    %80 = vector.broadcast %79 : f32 to vector<16x128xf32>
    %81 = arith.mulf %78, %80 : vector<16x128xf32>
    %82 = arith.addf %69, %81 : vector<16x128xf32>
    %c55 = arith.constant 55 : index
    %83 = memref.load %arg1[%c55] : memref<105xf32, #tpu.memory_space<smem>>
    %84 = vector.broadcast %83 : f32 to vector<16x128xf32>
    %85 = arith.mulf %78, %84 : vector<16x128xf32>
    %86 = arith.addf %73, %85 : vector<16x128xf32>
    %c56 = arith.constant 56 : index
    %87 = memref.load %arg1[%c56] : memref<105xf32, #tpu.memory_space<smem>>
    %88 = vector.broadcast %87 : f32 to vector<16x128xf32>
    %89 = arith.mulf %78, %88 : vector<16x128xf32>
    %90 = arith.addf %77, %89 : vector<16x128xf32>
    %91 = arith.mulf %1, %3 : vector<16x128xf32>
    %c18 = arith.constant 18 : index
    %92 = memref.load %arg1[%c18] : memref<105xf32, #tpu.memory_space<smem>>
    %93 = vector.broadcast %92 : f32 to vector<16x128xf32>
    %94 = arith.mulf %91, %93 : vector<16x128xf32>
    %95 = arith.addf %82, %94 : vector<16x128xf32>
    %c19 = arith.constant 19 : index
    %96 = memref.load %arg1[%c19] : memref<105xf32, #tpu.memory_space<smem>>
    %97 = vector.broadcast %96 : f32 to vector<16x128xf32>
    %98 = arith.mulf %91, %97 : vector<16x128xf32>
    %99 = arith.addf %86, %98 : vector<16x128xf32>
    %c20 = arith.constant 20 : index
    %100 = memref.load %arg1[%c20] : memref<105xf32, #tpu.memory_space<smem>>
    %101 = vector.broadcast %100 : f32 to vector<16x128xf32>
    %102 = arith.mulf %91, %101 : vector<16x128xf32>
    %103 = arith.addf %90, %102 : vector<16x128xf32>
    %104 = arith.mulf %91, %3 : vector<16x128xf32>
    %c57 = arith.constant 57 : index
    %105 = memref.load %arg1[%c57] : memref<105xf32, #tpu.memory_space<smem>>
    %106 = vector.broadcast %105 : f32 to vector<16x128xf32>
    %107 = arith.mulf %104, %106 : vector<16x128xf32>
    %108 = arith.addf %95, %107 : vector<16x128xf32>
    %c58 = arith.constant 58 : index
    %109 = memref.load %arg1[%c58] : memref<105xf32, #tpu.memory_space<smem>>
    %110 = vector.broadcast %109 : f32 to vector<16x128xf32>
    %111 = arith.mulf %104, %110 : vector<16x128xf32>
    %112 = arith.addf %99, %111 : vector<16x128xf32>
    %c59 = arith.constant 59 : index
    %113 = memref.load %arg1[%c59] : memref<105xf32, #tpu.memory_space<smem>>
    %114 = vector.broadcast %113 : f32 to vector<16x128xf32>
    %115 = arith.mulf %104, %114 : vector<16x128xf32>
    %116 = arith.addf %103, %115 : vector<16x128xf32>
    %117 = arith.mulf %91, %5 : vector<16x128xf32>
    %c60 = arith.constant 60 : index
    %118 = memref.load %arg1[%c60] : memref<105xf32, #tpu.memory_space<smem>>
    %119 = vector.broadcast %118 : f32 to vector<16x128xf32>
    %120 = arith.mulf %117, %119 : vector<16x128xf32>
    %121 = arith.addf %108, %120 : vector<16x128xf32>
    %c61 = arith.constant 61 : index
    %122 = memref.load %arg1[%c61] : memref<105xf32, #tpu.memory_space<smem>>
    %123 = vector.broadcast %122 : f32 to vector<16x128xf32>
    %124 = arith.mulf %117, %123 : vector<16x128xf32>
    %125 = arith.addf %112, %124 : vector<16x128xf32>
    %c62 = arith.constant 62 : index
    %126 = memref.load %arg1[%c62] : memref<105xf32, #tpu.memory_space<smem>>
    %127 = vector.broadcast %126 : f32 to vector<16x128xf32>
    %128 = arith.mulf %117, %127 : vector<16x128xf32>
    %129 = arith.addf %116, %128 : vector<16x128xf32>
    %130 = arith.mulf %91, %7 : vector<16x128xf32>
    %c63 = arith.constant 63 : index
    %131 = memref.load %arg1[%c63] : memref<105xf32, #tpu.memory_space<smem>>
    %132 = vector.broadcast %131 : f32 to vector<16x128xf32>
    %133 = arith.mulf %130, %132 : vector<16x128xf32>
    %134 = arith.addf %121, %133 : vector<16x128xf32>
    %c64 = arith.constant 64 : index
    %135 = memref.load %arg1[%c64] : memref<105xf32, #tpu.memory_space<smem>>
    %136 = vector.broadcast %135 : f32 to vector<16x128xf32>
    %137 = arith.mulf %130, %136 : vector<16x128xf32>
    %138 = arith.addf %125, %137 : vector<16x128xf32>
    %c65 = arith.constant 65 : index
    %139 = memref.load %arg1[%c65] : memref<105xf32, #tpu.memory_space<smem>>
    %140 = vector.broadcast %139 : f32 to vector<16x128xf32>
    %141 = arith.mulf %130, %140 : vector<16x128xf32>
    %142 = arith.addf %129, %141 : vector<16x128xf32>
    %143 = arith.mulf %1, %5 : vector<16x128xf32>
    %c21 = arith.constant 21 : index
    %144 = memref.load %arg1[%c21] : memref<105xf32, #tpu.memory_space<smem>>
    %145 = vector.broadcast %144 : f32 to vector<16x128xf32>
    %146 = arith.mulf %143, %145 : vector<16x128xf32>
    %147 = arith.addf %134, %146 : vector<16x128xf32>
    %c22 = arith.constant 22 : index
    %148 = memref.load %arg1[%c22] : memref<105xf32, #tpu.memory_space<smem>>
    %149 = vector.broadcast %148 : f32 to vector<16x128xf32>
    %150 = arith.mulf %143, %149 : vector<16x128xf32>
    %151 = arith.addf %138, %150 : vector<16x128xf32>
    %c23 = arith.constant 23 : index
    %152 = memref.load %arg1[%c23] : memref<105xf32, #tpu.memory_space<smem>>
    %153 = vector.broadcast %152 : f32 to vector<16x128xf32>
    %154 = arith.mulf %143, %153 : vector<16x128xf32>
    %155 = arith.addf %142, %154 : vector<16x128xf32>
    %156 = arith.mulf %143, %5 : vector<16x128xf32>
    %c66 = arith.constant 66 : index
    %157 = memref.load %arg1[%c66] : memref<105xf32, #tpu.memory_space<smem>>
    %158 = vector.broadcast %157 : f32 to vector<16x128xf32>
    %159 = arith.mulf %156, %158 : vector<16x128xf32>
    %160 = arith.addf %147, %159 : vector<16x128xf32>
    %c67 = arith.constant 67 : index
    %161 = memref.load %arg1[%c67] : memref<105xf32, #tpu.memory_space<smem>>
    %162 = vector.broadcast %161 : f32 to vector<16x128xf32>
    %163 = arith.mulf %156, %162 : vector<16x128xf32>
    %164 = arith.addf %151, %163 : vector<16x128xf32>
    %c68 = arith.constant 68 : index
    %165 = memref.load %arg1[%c68] : memref<105xf32, #tpu.memory_space<smem>>
    %166 = vector.broadcast %165 : f32 to vector<16x128xf32>
    %167 = arith.mulf %156, %166 : vector<16x128xf32>
    %168 = arith.addf %155, %167 : vector<16x128xf32>
    %169 = arith.mulf %143, %7 : vector<16x128xf32>
    %c69 = arith.constant 69 : index
    %170 = memref.load %arg1[%c69] : memref<105xf32, #tpu.memory_space<smem>>
    %171 = vector.broadcast %170 : f32 to vector<16x128xf32>
    %172 = arith.mulf %169, %171 : vector<16x128xf32>
    %173 = arith.addf %160, %172 : vector<16x128xf32>
    %c70 = arith.constant 70 : index
    %174 = memref.load %arg1[%c70] : memref<105xf32, #tpu.memory_space<smem>>
    %175 = vector.broadcast %174 : f32 to vector<16x128xf32>
    %176 = arith.mulf %169, %175 : vector<16x128xf32>
    %177 = arith.addf %164, %176 : vector<16x128xf32>
    %c71 = arith.constant 71 : index
    %178 = memref.load %arg1[%c71] : memref<105xf32, #tpu.memory_space<smem>>
    %179 = vector.broadcast %178 : f32 to vector<16x128xf32>
    %180 = arith.mulf %169, %179 : vector<16x128xf32>
    %181 = arith.addf %168, %180 : vector<16x128xf32>
    %182 = arith.mulf %1, %7 : vector<16x128xf32>
    %c24 = arith.constant 24 : index
    %183 = memref.load %arg1[%c24] : memref<105xf32, #tpu.memory_space<smem>>
    %184 = vector.broadcast %183 : f32 to vector<16x128xf32>
    %185 = arith.mulf %182, %184 : vector<16x128xf32>
    %186 = arith.addf %173, %185 : vector<16x128xf32>
    %c25 = arith.constant 25 : index
    %187 = memref.load %arg1[%c25] : memref<105xf32, #tpu.memory_space<smem>>
    %188 = vector.broadcast %187 : f32 to vector<16x128xf32>
    %189 = arith.mulf %182, %188 : vector<16x128xf32>
    %190 = arith.addf %177, %189 : vector<16x128xf32>
    %c26 = arith.constant 26 : index
    %191 = memref.load %arg1[%c26] : memref<105xf32, #tpu.memory_space<smem>>
    %192 = vector.broadcast %191 : f32 to vector<16x128xf32>
    %193 = arith.mulf %182, %192 : vector<16x128xf32>
    %194 = arith.addf %181, %193 : vector<16x128xf32>
    %195 = arith.mulf %182, %7 : vector<16x128xf32>
    %c72 = arith.constant 72 : index
    %196 = memref.load %arg1[%c72] : memref<105xf32, #tpu.memory_space<smem>>
    %197 = vector.broadcast %196 : f32 to vector<16x128xf32>
    %198 = arith.mulf %195, %197 : vector<16x128xf32>
    %199 = arith.addf %186, %198 : vector<16x128xf32>
    %c73 = arith.constant 73 : index
    %200 = memref.load %arg1[%c73] : memref<105xf32, #tpu.memory_space<smem>>
    %201 = vector.broadcast %200 : f32 to vector<16x128xf32>
    %202 = arith.mulf %195, %201 : vector<16x128xf32>
    %203 = arith.addf %190, %202 : vector<16x128xf32>
    %c74 = arith.constant 74 : index
    %204 = memref.load %arg1[%c74] : memref<105xf32, #tpu.memory_space<smem>>
    %205 = vector.broadcast %204 : f32 to vector<16x128xf32>
    %206 = arith.mulf %195, %205 : vector<16x128xf32>
    %207 = arith.addf %194, %206 : vector<16x128xf32>
    %c6 = arith.constant 6 : index
    %208 = memref.load %arg1[%c6] : memref<105xf32, #tpu.memory_space<smem>>
    %209 = vector.broadcast %208 : f32 to vector<16x128xf32>
    %210 = arith.mulf %3, %209 : vector<16x128xf32>
    %211 = arith.addf %199, %210 : vector<16x128xf32>
    %c7 = arith.constant 7 : index
    %212 = memref.load %arg1[%c7] : memref<105xf32, #tpu.memory_space<smem>>
    %213 = vector.broadcast %212 : f32 to vector<16x128xf32>
    %214 = arith.mulf %3, %213 : vector<16x128xf32>
    %215 = arith.addf %203, %214 : vector<16x128xf32>
    %c8 = arith.constant 8 : index
    %216 = memref.load %arg1[%c8] : memref<105xf32, #tpu.memory_space<smem>>
    %217 = vector.broadcast %216 : f32 to vector<16x128xf32>
    %218 = arith.mulf %3, %217 : vector<16x128xf32>
    %219 = arith.addf %207, %218 : vector<16x128xf32>
    %220 = arith.mulf %3, %3 : vector<16x128xf32>
    %c27 = arith.constant 27 : index
    %221 = memref.load %arg1[%c27] : memref<105xf32, #tpu.memory_space<smem>>
    %222 = vector.broadcast %221 : f32 to vector<16x128xf32>
    %223 = arith.mulf %220, %222 : vector<16x128xf32>
    %224 = arith.addf %211, %223 : vector<16x128xf32>
    %c28 = arith.constant 28 : index
    %225 = memref.load %arg1[%c28] : memref<105xf32, #tpu.memory_space<smem>>
    %226 = vector.broadcast %225 : f32 to vector<16x128xf32>
    %227 = arith.mulf %220, %226 : vector<16x128xf32>
    %228 = arith.addf %215, %227 : vector<16x128xf32>
    %c29 = arith.constant 29 : index
    %229 = memref.load %arg1[%c29] : memref<105xf32, #tpu.memory_space<smem>>
    %230 = vector.broadcast %229 : f32 to vector<16x128xf32>
    %231 = arith.mulf %220, %230 : vector<16x128xf32>
    %232 = arith.addf %219, %231 : vector<16x128xf32>
    %233 = arith.mulf %220, %3 : vector<16x128xf32>
    %c75 = arith.constant 75 : index
    %234 = memref.load %arg1[%c75] : memref<105xf32, #tpu.memory_space<smem>>
    %235 = vector.broadcast %234 : f32 to vector<16x128xf32>
    %236 = arith.mulf %233, %235 : vector<16x128xf32>
    %237 = arith.addf %224, %236 : vector<16x128xf32>
    %c76 = arith.constant 76 : index
    %238 = memref.load %arg1[%c76] : memref<105xf32, #tpu.memory_space<smem>>
    %239 = vector.broadcast %238 : f32 to vector<16x128xf32>
    %240 = arith.mulf %233, %239 : vector<16x128xf32>
    %241 = arith.addf %228, %240 : vector<16x128xf32>
    %c77 = arith.constant 77 : index
    %242 = memref.load %arg1[%c77] : memref<105xf32, #tpu.memory_space<smem>>
    %243 = vector.broadcast %242 : f32 to vector<16x128xf32>
    %244 = arith.mulf %233, %243 : vector<16x128xf32>
    %245 = arith.addf %232, %244 : vector<16x128xf32>
    %246 = arith.mulf %220, %5 : vector<16x128xf32>
    %c78 = arith.constant 78 : index
    %247 = memref.load %arg1[%c78] : memref<105xf32, #tpu.memory_space<smem>>
    %248 = vector.broadcast %247 : f32 to vector<16x128xf32>
    %249 = arith.mulf %246, %248 : vector<16x128xf32>
    %250 = arith.addf %237, %249 : vector<16x128xf32>
    %c79 = arith.constant 79 : index
    %251 = memref.load %arg1[%c79] : memref<105xf32, #tpu.memory_space<smem>>
    %252 = vector.broadcast %251 : f32 to vector<16x128xf32>
    %253 = arith.mulf %246, %252 : vector<16x128xf32>
    %254 = arith.addf %241, %253 : vector<16x128xf32>
    %c80 = arith.constant 80 : index
    %255 = memref.load %arg1[%c80] : memref<105xf32, #tpu.memory_space<smem>>
    %256 = vector.broadcast %255 : f32 to vector<16x128xf32>
    %257 = arith.mulf %246, %256 : vector<16x128xf32>
    %258 = arith.addf %245, %257 : vector<16x128xf32>
    %259 = arith.mulf %220, %7 : vector<16x128xf32>
    %c81 = arith.constant 81 : index
    %260 = memref.load %arg1[%c81] : memref<105xf32, #tpu.memory_space<smem>>
    %261 = vector.broadcast %260 : f32 to vector<16x128xf32>
    %262 = arith.mulf %259, %261 : vector<16x128xf32>
    %263 = arith.addf %250, %262 : vector<16x128xf32>
    %c82 = arith.constant 82 : index
    %264 = memref.load %arg1[%c82] : memref<105xf32, #tpu.memory_space<smem>>
    %265 = vector.broadcast %264 : f32 to vector<16x128xf32>
    %266 = arith.mulf %259, %265 : vector<16x128xf32>
    %267 = arith.addf %254, %266 : vector<16x128xf32>
    %c83 = arith.constant 83 : index
    %268 = memref.load %arg1[%c83] : memref<105xf32, #tpu.memory_space<smem>>
    %269 = vector.broadcast %268 : f32 to vector<16x128xf32>
    %270 = arith.mulf %259, %269 : vector<16x128xf32>
    %271 = arith.addf %258, %270 : vector<16x128xf32>
    %272 = arith.mulf %3, %5 : vector<16x128xf32>
    %c30 = arith.constant 30 : index
    %273 = memref.load %arg1[%c30] : memref<105xf32, #tpu.memory_space<smem>>
    %274 = vector.broadcast %273 : f32 to vector<16x128xf32>
    %275 = arith.mulf %272, %274 : vector<16x128xf32>
    %276 = arith.addf %263, %275 : vector<16x128xf32>
    %c31 = arith.constant 31 : index
    %277 = memref.load %arg1[%c31] : memref<105xf32, #tpu.memory_space<smem>>
    %278 = vector.broadcast %277 : f32 to vector<16x128xf32>
    %279 = arith.mulf %272, %278 : vector<16x128xf32>
    %280 = arith.addf %267, %279 : vector<16x128xf32>
    %c32 = arith.constant 32 : index
    %281 = memref.load %arg1[%c32] : memref<105xf32, #tpu.memory_space<smem>>
    %282 = vector.broadcast %281 : f32 to vector<16x128xf32>
    %283 = arith.mulf %272, %282 : vector<16x128xf32>
    %284 = arith.addf %271, %283 : vector<16x128xf32>
    %285 = arith.mulf %272, %5 : vector<16x128xf32>
    %c84 = arith.constant 84 : index
    %286 = memref.load %arg1[%c84] : memref<105xf32, #tpu.memory_space<smem>>
    %287 = vector.broadcast %286 : f32 to vector<16x128xf32>
    %288 = arith.mulf %285, %287 : vector<16x128xf32>
    %289 = arith.addf %276, %288 : vector<16x128xf32>
    %c85 = arith.constant 85 : index
    %290 = memref.load %arg1[%c85] : memref<105xf32, #tpu.memory_space<smem>>
    %291 = vector.broadcast %290 : f32 to vector<16x128xf32>
    %292 = arith.mulf %285, %291 : vector<16x128xf32>
    %293 = arith.addf %280, %292 : vector<16x128xf32>
    %c86 = arith.constant 86 : index
    %294 = memref.load %arg1[%c86] : memref<105xf32, #tpu.memory_space<smem>>
    %295 = vector.broadcast %294 : f32 to vector<16x128xf32>
    %296 = arith.mulf %285, %295 : vector<16x128xf32>
    %297 = arith.addf %284, %296 : vector<16x128xf32>
    %298 = arith.mulf %272, %7 : vector<16x128xf32>
    %c87 = arith.constant 87 : index
    %299 = memref.load %arg1[%c87] : memref<105xf32, #tpu.memory_space<smem>>
    %300 = vector.broadcast %299 : f32 to vector<16x128xf32>
    %301 = arith.mulf %298, %300 : vector<16x128xf32>
    %302 = arith.addf %289, %301 : vector<16x128xf32>
    %c88 = arith.constant 88 : index
    %303 = memref.load %arg1[%c88] : memref<105xf32, #tpu.memory_space<smem>>
    %304 = vector.broadcast %303 : f32 to vector<16x128xf32>
    %305 = arith.mulf %298, %304 : vector<16x128xf32>
    %306 = arith.addf %293, %305 : vector<16x128xf32>
    %c89 = arith.constant 89 : index
    %307 = memref.load %arg1[%c89] : memref<105xf32, #tpu.memory_space<smem>>
    %308 = vector.broadcast %307 : f32 to vector<16x128xf32>
    %309 = arith.mulf %298, %308 : vector<16x128xf32>
    %310 = arith.addf %297, %309 : vector<16x128xf32>
    %311 = arith.mulf %3, %7 : vector<16x128xf32>
    %c33 = arith.constant 33 : index
    %312 = memref.load %arg1[%c33] : memref<105xf32, #tpu.memory_space<smem>>
    %313 = vector.broadcast %312 : f32 to vector<16x128xf32>
    %314 = arith.mulf %311, %313 : vector<16x128xf32>
    %315 = arith.addf %302, %314 : vector<16x128xf32>
    %c34 = arith.constant 34 : index
    %316 = memref.load %arg1[%c34] : memref<105xf32, #tpu.memory_space<smem>>
    %317 = vector.broadcast %316 : f32 to vector<16x128xf32>
    %318 = arith.mulf %311, %317 : vector<16x128xf32>
    %319 = arith.addf %306, %318 : vector<16x128xf32>
    %c35 = arith.constant 35 : index
    %320 = memref.load %arg1[%c35] : memref<105xf32, #tpu.memory_space<smem>>
    %321 = vector.broadcast %320 : f32 to vector<16x128xf32>
    %322 = arith.mulf %311, %321 : vector<16x128xf32>
    %323 = arith.addf %310, %322 : vector<16x128xf32>
    %324 = arith.mulf %311, %7 : vector<16x128xf32>
    %c90 = arith.constant 90 : index
    %325 = memref.load %arg1[%c90] : memref<105xf32, #tpu.memory_space<smem>>
    %326 = vector.broadcast %325 : f32 to vector<16x128xf32>
    %327 = arith.mulf %324, %326 : vector<16x128xf32>
    %328 = arith.addf %315, %327 : vector<16x128xf32>
    %c91 = arith.constant 91 : index
    %329 = memref.load %arg1[%c91] : memref<105xf32, #tpu.memory_space<smem>>
    %330 = vector.broadcast %329 : f32 to vector<16x128xf32>
    %331 = arith.mulf %324, %330 : vector<16x128xf32>
    %332 = arith.addf %319, %331 : vector<16x128xf32>
    %c92 = arith.constant 92 : index
    %333 = memref.load %arg1[%c92] : memref<105xf32, #tpu.memory_space<smem>>
    %334 = vector.broadcast %333 : f32 to vector<16x128xf32>
    %335 = arith.mulf %324, %334 : vector<16x128xf32>
    %336 = arith.addf %323, %335 : vector<16x128xf32>
    %c9 = arith.constant 9 : index
    %337 = memref.load %arg1[%c9] : memref<105xf32, #tpu.memory_space<smem>>
    %338 = vector.broadcast %337 : f32 to vector<16x128xf32>
    %339 = arith.mulf %5, %338 : vector<16x128xf32>
    %340 = arith.addf %328, %339 : vector<16x128xf32>
    %c10 = arith.constant 10 : index
    %341 = memref.load %arg1[%c10] : memref<105xf32, #tpu.memory_space<smem>>
    %342 = vector.broadcast %341 : f32 to vector<16x128xf32>
    %343 = arith.mulf %5, %342 : vector<16x128xf32>
    %344 = arith.addf %332, %343 : vector<16x128xf32>
    %c11 = arith.constant 11 : index
    %345 = memref.load %arg1[%c11] : memref<105xf32, #tpu.memory_space<smem>>
    %346 = vector.broadcast %345 : f32 to vector<16x128xf32>
    %347 = arith.mulf %5, %346 : vector<16x128xf32>
    %348 = arith.addf %336, %347 : vector<16x128xf32>
    %349 = arith.mulf %5, %5 : vector<16x128xf32>
    %c36 = arith.constant 36 : index
    %350 = memref.load %arg1[%c36] : memref<105xf32, #tpu.memory_space<smem>>
    %351 = vector.broadcast %350 : f32 to vector<16x128xf32>
    %352 = arith.mulf %349, %351 : vector<16x128xf32>
    %353 = arith.addf %340, %352 : vector<16x128xf32>
    %c37 = arith.constant 37 : index
    %354 = memref.load %arg1[%c37] : memref<105xf32, #tpu.memory_space<smem>>
    %355 = vector.broadcast %354 : f32 to vector<16x128xf32>
    %356 = arith.mulf %349, %355 : vector<16x128xf32>
    %357 = arith.addf %344, %356 : vector<16x128xf32>
    %c38 = arith.constant 38 : index
    %358 = memref.load %arg1[%c38] : memref<105xf32, #tpu.memory_space<smem>>
    %359 = vector.broadcast %358 : f32 to vector<16x128xf32>
    %360 = arith.mulf %349, %359 : vector<16x128xf32>
    %361 = arith.addf %348, %360 : vector<16x128xf32>
    %362 = arith.mulf %349, %5 : vector<16x128xf32>
    %c93 = arith.constant 93 : index
    %363 = memref.load %arg1[%c93] : memref<105xf32, #tpu.memory_space<smem>>
    %364 = vector.broadcast %363 : f32 to vector<16x128xf32>
    %365 = arith.mulf %362, %364 : vector<16x128xf32>
    %366 = arith.addf %353, %365 : vector<16x128xf32>
    %c94 = arith.constant 94 : index
    %367 = memref.load %arg1[%c94] : memref<105xf32, #tpu.memory_space<smem>>
    %368 = vector.broadcast %367 : f32 to vector<16x128xf32>
    %369 = arith.mulf %362, %368 : vector<16x128xf32>
    %370 = arith.addf %357, %369 : vector<16x128xf32>
    %c95 = arith.constant 95 : index
    %371 = memref.load %arg1[%c95] : memref<105xf32, #tpu.memory_space<smem>>
    %372 = vector.broadcast %371 : f32 to vector<16x128xf32>
    %373 = arith.mulf %362, %372 : vector<16x128xf32>
    %374 = arith.addf %361, %373 : vector<16x128xf32>
    %375 = arith.mulf %349, %7 : vector<16x128xf32>
    %c96 = arith.constant 96 : index
    %376 = memref.load %arg1[%c96] : memref<105xf32, #tpu.memory_space<smem>>
    %377 = vector.broadcast %376 : f32 to vector<16x128xf32>
    %378 = arith.mulf %375, %377 : vector<16x128xf32>
    %379 = arith.addf %366, %378 : vector<16x128xf32>
    %c97 = arith.constant 97 : index
    %380 = memref.load %arg1[%c97] : memref<105xf32, #tpu.memory_space<smem>>
    %381 = vector.broadcast %380 : f32 to vector<16x128xf32>
    %382 = arith.mulf %375, %381 : vector<16x128xf32>
    %383 = arith.addf %370, %382 : vector<16x128xf32>
    %c98 = arith.constant 98 : index
    %384 = memref.load %arg1[%c98] : memref<105xf32, #tpu.memory_space<smem>>
    %385 = vector.broadcast %384 : f32 to vector<16x128xf32>
    %386 = arith.mulf %375, %385 : vector<16x128xf32>
    %387 = arith.addf %374, %386 : vector<16x128xf32>
    %388 = arith.mulf %5, %7 : vector<16x128xf32>
    %c39 = arith.constant 39 : index
    %389 = memref.load %arg1[%c39] : memref<105xf32, #tpu.memory_space<smem>>
    %390 = vector.broadcast %389 : f32 to vector<16x128xf32>
    %391 = arith.mulf %388, %390 : vector<16x128xf32>
    %392 = arith.addf %379, %391 : vector<16x128xf32>
    %c40 = arith.constant 40 : index
    %393 = memref.load %arg1[%c40] : memref<105xf32, #tpu.memory_space<smem>>
    %394 = vector.broadcast %393 : f32 to vector<16x128xf32>
    %395 = arith.mulf %388, %394 : vector<16x128xf32>
    %396 = arith.addf %383, %395 : vector<16x128xf32>
    %c41 = arith.constant 41 : index
    %397 = memref.load %arg1[%c41] : memref<105xf32, #tpu.memory_space<smem>>
    %398 = vector.broadcast %397 : f32 to vector<16x128xf32>
    %399 = arith.mulf %388, %398 : vector<16x128xf32>
    %400 = arith.addf %387, %399 : vector<16x128xf32>
    %401 = arith.mulf %388, %7 : vector<16x128xf32>
    %c99 = arith.constant 99 : index
    %402 = memref.load %arg1[%c99] : memref<105xf32, #tpu.memory_space<smem>>
    %403 = vector.broadcast %402 : f32 to vector<16x128xf32>
    %404 = arith.mulf %401, %403 : vector<16x128xf32>
    %405 = arith.addf %392, %404 : vector<16x128xf32>
    %c100 = arith.constant 100 : index
    %406 = memref.load %arg1[%c100] : memref<105xf32, #tpu.memory_space<smem>>
    %407 = vector.broadcast %406 : f32 to vector<16x128xf32>
    %408 = arith.mulf %401, %407 : vector<16x128xf32>
    %409 = arith.addf %396, %408 : vector<16x128xf32>
    %c101 = arith.constant 101 : index
    %410 = memref.load %arg1[%c101] : memref<105xf32, #tpu.memory_space<smem>>
    %411 = vector.broadcast %410 : f32 to vector<16x128xf32>
    %412 = arith.mulf %401, %411 : vector<16x128xf32>
    %413 = arith.addf %400, %412 : vector<16x128xf32>
    %c12 = arith.constant 12 : index
    %414 = memref.load %arg1[%c12] : memref<105xf32, #tpu.memory_space<smem>>
    %415 = vector.broadcast %414 : f32 to vector<16x128xf32>
    %416 = arith.mulf %7, %415 : vector<16x128xf32>
    %417 = arith.addf %405, %416 : vector<16x128xf32>
    %c13 = arith.constant 13 : index
    %418 = memref.load %arg1[%c13] : memref<105xf32, #tpu.memory_space<smem>>
    %419 = vector.broadcast %418 : f32 to vector<16x128xf32>
    %420 = arith.mulf %7, %419 : vector<16x128xf32>
    %421 = arith.addf %409, %420 : vector<16x128xf32>
    %c14 = arith.constant 14 : index
    %422 = memref.load %arg1[%c14] : memref<105xf32, #tpu.memory_space<smem>>
    %423 = vector.broadcast %422 : f32 to vector<16x128xf32>
    %424 = arith.mulf %7, %423 : vector<16x128xf32>
    %425 = arith.addf %413, %424 : vector<16x128xf32>
    %426 = arith.mulf %7, %7 : vector<16x128xf32>
    %c42 = arith.constant 42 : index
    %427 = memref.load %arg1[%c42] : memref<105xf32, #tpu.memory_space<smem>>
    %428 = vector.broadcast %427 : f32 to vector<16x128xf32>
    %429 = arith.mulf %426, %428 : vector<16x128xf32>
    %430 = arith.addf %417, %429 : vector<16x128xf32>
    %c43 = arith.constant 43 : index
    %431 = memref.load %arg1[%c43] : memref<105xf32, #tpu.memory_space<smem>>
    %432 = vector.broadcast %431 : f32 to vector<16x128xf32>
    %433 = arith.mulf %426, %432 : vector<16x128xf32>
    %434 = arith.addf %421, %433 : vector<16x128xf32>
    %c44 = arith.constant 44 : index
    %435 = memref.load %arg1[%c44] : memref<105xf32, #tpu.memory_space<smem>>
    %436 = vector.broadcast %435 : f32 to vector<16x128xf32>
    %437 = arith.mulf %426, %436 : vector<16x128xf32>
    %438 = arith.addf %425, %437 : vector<16x128xf32>
    %439 = arith.mulf %426, %7 : vector<16x128xf32>
    %c102 = arith.constant 102 : index
    %440 = memref.load %arg1[%c102] : memref<105xf32, #tpu.memory_space<smem>>
    %441 = vector.broadcast %440 : f32 to vector<16x128xf32>
    %442 = arith.mulf %439, %441 : vector<16x128xf32>
    %443 = arith.addf %430, %442 : vector<16x128xf32>
    %c103 = arith.constant 103 : index
    %444 = memref.load %arg1[%c103] : memref<105xf32, #tpu.memory_space<smem>>
    %445 = vector.broadcast %444 : f32 to vector<16x128xf32>
    %446 = arith.mulf %439, %445 : vector<16x128xf32>
    %447 = arith.addf %434, %446 : vector<16x128xf32>
    %c104 = arith.constant 104 : index
    %448 = memref.load %arg1[%c104] : memref<105xf32, #tpu.memory_space<smem>>
    %449 = vector.broadcast %448 : f32 to vector<16x128xf32>
    %450 = arith.mulf %439, %449 : vector<16x128xf32>
    %451 = arith.addf %438, %450 : vector<16x128xf32>
    %c0_12 = arith.constant 0 : index
    %c0_13 = arith.constant 0 : index
    %c0_14 = arith.constant 0 : index
    %452 = vector.load %arg3[%c0_12, %c0_13, %c0_14] : memref<3x16x128xf32, #tpu.memory_space<vmem>>, vector<1x16x128xf32>
    %453 = vector.shape_cast %452 : vector<1x16x128xf32> to vector<16x128xf32>
    %454 = vector.shape_cast %443 : vector<16x128xf32> to vector<1x16x128xf32>
    tpu.vector_store %arg3[%c0_12, %c0_13, %c0_14], %454 {strides = array<i32>} : memref<3x16x128xf32, #tpu.memory_space<vmem>>, vector<1x16x128xf32>,
    %c1_15 = arith.constant 1 : index
    %c0_16 = arith.constant 0 : index
    %c0_17 = arith.constant 0 : index
    %455 = vector.load %arg3[%c1_15, %c0_16, %c0_17] : memref<3x16x128xf32, #tpu.memory_space<vmem>>, vector<1x16x128xf32>
    %456 = vector.shape_cast %455 : vector<1x16x128xf32> to vector<16x128xf32>
    %457 = vector.shape_cast %447 : vector<16x128xf32> to vector<1x16x128xf32>
    tpu.vector_store %arg3[%c1_15, %c0_16, %c0_17], %457 {strides = array<i32>} : memref<3x16x128xf32, #tpu.memory_space<vmem>>, vector<1x16x128xf32>,
    %c2_18 = arith.constant 2 : index
    %c0_19 = arith.constant 0 : index
    %c0_20 = arith.constant 0 : index
    %458 = vector.load %arg3[%c2_18, %c0_19, %c0_20] : memref<3x16x128xf32, #tpu.memory_space<vmem>>, vector<1x16x128xf32>
    %459 = vector.shape_cast %458 : vector<1x16x128xf32> to vector<16x128xf32>
    %460 = vector.shape_cast %451 : vector<16x128xf32> to vector<1x16x128xf32>
    tpu.vector_store %arg3[%c2_18, %c0_19, %c0_20], %460 {strides = array<i32>} : memref<3x16x128xf32, #tpu.memory_space<vmem>>, vector<1x16x128xf32>,
    return
  }
  func.func @transform_0(%arg0: i32) -> i32 {
    %c0_i32 = arith.constant 0 : i32
    %c0_i32_0 = arith.constant 0 : i32
    return %c0_i32 : i32
  }
  func.func @transform_1(%arg0: i32) -> (i32, i32, i32) {
    %c0_i32 = arith.constant 0 : i32
    %c0_i32_0 = arith.constant 0 : i32
    %c0_i32_1 = arith.constant 0 : i32
    return %c0_i32, %arg0, %c0_i32_0 : i32, i32, i32
  }
  func.func @transform_2(%arg0: i32) -> (i32, i32, i32) {
    %c0_i32 = arith.constant 0 : i32
    %c0_i32_0 = arith.constant 0 : i32
    %c0_i32_1 = arith.constant 0 : i32
    return %c0_i32, %arg0, %c0_i32_0 : i32, i32, i32
  }
}

</mosaic_0001>

<bundles_post_ra>
// kernel: _odenet_forward_impl.1
= control target key start
LH: loop header
LB: loop body
LE: loop exit
PB: predicated region body
PF: predicated region fallthrough
CT: control target
= control target key end

     0   :  { %7 = vsyncpa [#allocation3], 0  ;;  %s859_s12 = smov [#allocation2]   ;;  %s1466_s0 = inlined_call_operand.vmem [shape: f32[105], index: 0, kind: input, shape index: {}]   ;;  %s1467_s1 = inlined_call_operand.vmem [shape: f32[4,16,128], index: 1, kind: input, shape index: {}]   ;;  %s1468_s2 = inlined_call_operand.vmem [shape: f32[3,16,128], index: 2, kind: output, shape index: {}]  }
   0x1   :  { %s13_s11 = sshll.u32 %s1466_s0, 4  ;;  %s14_s11 = int_to_ptr.vmem [resolvable:$true] %s13_s11 }
   0x2   :  { %16 = dma.vmem_to_smem %s14_s11, 16, %s859_s12, [#allocation3]  }
   0x3   :  { %857 = dma.done.wait [#allocation3], 16  }
   0x4   :  { %858 = vsyncadd [#allocation3], 4294967280 }
   0x5   :  { %23 = sfence }
   0x6   :  { %v881_v0 = vld [vmem:[%s1467_s1] sm:$0xff]  ;;  %v886_v1 = vld [vmem:[%s1467_s1 + $0x8] sm:$0xff]  ;;  %s888_s17 = sld [smem:[#allocation2]]  ;;  %v905_v4 = vld [vmem:[%s1467_s1 + $0x10] sm:$0xff] }
   0x7   :  { %s890_s18 = sld [smem:[#allocation2 + $0x1]]  ;;  %v896_v2 = vmul.f32 %v881_v0, %v881_v0  ;;  %v900_v3 = vmul.f32 %v886_v1, %v886_v1  ;;  %v910_v5 = vld [vmem:[%s1467_s1 + $0x18] sm:$0xff]  ;;  %v915_v6 = vld [vmem:[%s1467_s1 + $0x20] sm:$0xff]  ;;  %v920_v7 = vld [vmem:[%s1467_s1 + $0x28] sm:$0xff]  ;;  %v934_v10 = vmul.f32 %v905_v4, %v881_v0 }
   0x8   :  { %s892_s0 = sld [smem:[#allocation2 + $0x2]]  ;;  %v925_v8 = vld [vmem:[%s1467_s1 + $0x30] sm:$0xff]  ;;  %v930_v9 = vld [vmem:[%s1467_s1 + $0x38] sm:$0xff]  ;;  %v938_v11 = vmul.f32 %v910_v5, %v886_v1 }
   0x9   :  { %s734_s25 = sld [smem:[#allocation2 + $0x3]]  ;;  %v946_v12 = vmul.f32 %v896_v2, %v881_v0  ;;  %v950_v13 = vmul.f32 %v900_v3, %v886_v1  ;;  %v954_v14 = vmul.f32 %v905_v4, %v896_v2  ;;  %v958_v15 = vmul.f32 %v910_v5, %v900_v3 }
   0xa   :  { %s735_s4 = sld [smem:[#allocation2 + $0x4]]  ;;  %v964_v16 = vmul.f32 %v915_v6, %v896_v2  ;;  %v968_v17 = vmul.f32 %v920_v7, %v900_v3  ;;  %v972_v18 = vmul.f32 %v925_v8, %v896_v2  ;;  %v976_v19 = vmul.f32 %v930_v9, %v900_v3 }
   0xb   :  { %s940_s5 = sld [smem:[#allocation2 + $0x5]]  ;;  %v984_v22 = vmul.f32 %v905_v4, %v934_v10  ;;  %v988_v23 = vmul.f32 %v910_v5, %v938_v11  ;;  %v995_v26 = vmul.f32 %v915_v6, %v934_v10  ;;  %v999_v27 = vmul.f32 %v920_v7, %v938_v11 }
   0xc   :  { %s942_s6 = sld [smem:[#allocation2 + $0xf]]  ;;  %v36_v20 = vstv %s888_s17  ;;  %v1007_v31 = vmul.f32 %v925_v8, %v934_v10  ;;  %v1016_v35 = vmul.f32 %v930_v9, %v938_v11 }
   0xd   :  { %s960_s7 = sld [smem:[#allocation2 + $0x10]]  ;;  %v38_v21 = vstv %s890_s18 }
   0xe   :  { %s980_s8 = sld [smem:[#allocation2 + $0x11]]  ;;  %v40_v24 = vstv %s892_s0 }
   0xf   :  { %v42_v25 = vstv %s734_s25  ;;  %s991_s9 = sld [smem:[#allocation2 + $0x2d]] }
  0x10   :  { %v43_v28 = vmul.f32 %v42_v25, %v881_v0  ;;  %v44_v29 = vmul.f32 %v42_v25, %v886_v1  ;;  %v48_v30 = vstv %s735_s4  ;;  %s1003_s10 = sld [smem:[#allocation2 + $0x2e]] }
  0x11   :  { %v49_v32 = vmul.f32 %v48_v30, %v881_v0  ;;  %v50_v33 = vmul.f32 %v48_v30, %v886_v1  ;;  %v54_v34 = vstv %s940_s5  ;;  %s1012_s11 = sld [smem:[#allocation2 + $0x2f]] }
  0x12   :  { %v45_v36 = vadd.f32 %v43_v28, %v36_v20  ;;  %v46_v37 = vadd.f32 %v44_v29, %v36_v20  ;;  %v55_v38 = vmul.f32 %v54_v34, %v881_v0  ;;  %v56_v39 = vmul.f32 %v54_v34, %v886_v1  ;;  %s1020_s12 = sld [smem:[#allocation2 + $0x30]] }
  0x13   :  { %v51_v40 = vadd.f32 %v49_v32, %v38_v21  ;;  %v52_v41 = vadd.f32 %v50_v33, %v38_v21  ;;  %v62_v42 = vstv %s942_s6  ;;  %v68_v43 = vstv %s960_s7  ;;  %s1024_s13 = sld [smem:[#allocation2 + $0x31]] }
  0x14   :  { %v57_v44 = vadd.f32 %v55_v38, %v40_v24  ;;  %v58_v45 = vadd.f32 %v56_v39, %v40_v24  ;;  %v63_v46 = vmul.f32 %v62_v42, %v896_v2  ;;  %v64_v47 = vmul.f32 %v62_v42, %v900_v3  ;;  %s1028_s14 = sld [smem:[#allocation2 + $0x32]] }
  0x15   :  { %v69_v48 = vmul.f32 %v68_v43, %v896_v2  ;;  %v70_v49 = vmul.f32 %v68_v43, %v900_v3  ;;  %v74_v50 = vstv %s980_s8  ;;  %v82_v51 = vstv %s991_s9  ;;  %s1034_s15 = sld [smem:[#allocation2 + $0x33]] }
  0x16   :  { %v65_v52 = vadd.f32 %v63_v46, %v45_v36  ;;  %v66_v53 = vadd.f32 %v64_v47, %v46_v37  ;;  %v75_v54 = vmul.f32 %v74_v50, %v896_v2  ;;  %v76_v55 = vmul.f32 %v74_v50, %v900_v3  ;;  %s1038_s16 = sld [smem:[#allocation2 + $0x34]] }
  0x17   :  { %v71_v56 = vadd.f32 %v69_v48, %v51_v40  ;;  %v72_v57 = vadd.f32 %v70_v49, %v52_v41  ;;  %v83_v58 = vmul.f32 %v82_v51, %v946_v12  ;;  %v84_v59 = vmul.f32 %v82_v51, %v950_v13  ;;  %s1042_s17 = sld [smem:[#allocation2 + $0x35]] }
  0x18   :  { %v77_v60 = vadd.f32 %v75_v54, %v57_v44  ;;  %v78_v61 = vadd.f32 %v76_v55, %v58_v45  ;;  %v88_v62 = vstv %s1003_s10  ;;  %v94_v63 = vstv %s1012_s11  ;;  %s1048_s18 = sld [smem:[#allocation2 + $0x36]] }
  0x19   :  { %v85_v20 = vadd.f32 %v83_v58, %v65_v52  ;;  %v86_v2 = vadd.f32 %v84_v59, %v66_v53  ;;  %v89_v3 = vmul.f32 %v88_v62, %v946_v12  ;;  %v90_v21 = vmul.f32 %v88_v62, %v950_v13  ;;  %s1054_s0 = sld [smem:[#allocation2 + $0x37]] }
  0x1a   :  { %v95_v24 = vmul.f32 %v94_v63, %v946_v12  ;;  %v96_v25 = vmul.f32 %v94_v63, %v950_v13  ;;  %v102_v28 = vstv %s1020_s12  ;;  %v108_v29 = vstv %s1024_s13  ;;  %s1058_s19 = sld [smem:[#allocation2 + $0x38]] }
  0x1b   :  { %v91_v30 = vadd.f32 %v89_v3, %v71_v56  ;;  %v92_v32 = vadd.f32 %v90_v21, %v72_v57  ;;  %v103_v33 = vmul.f32 %v102_v28, %v954_v14  ;;  %v104_v34 = vmul.f32 %v102_v28, %v958_v15  ;;  %s1062_s20 = sld [smem:[#allocation2 + $0x12]] }
  0x1c   :  { %v97_v36 = vadd.f32 %v95_v24, %v77_v60  ;;  %v98_v37 = vadd.f32 %v96_v25, %v78_v61  ;;  %v109_v12 = vmul.f32 %v108_v29, %v954_v14  ;;  %v110_v13 = vmul.f32 %v108_v29, %v958_v15  ;;  %s1068_s21 = sld [smem:[#allocation2 + $0x13]] }
  0x1d   :  { %v105_v38 = vadd.f32 %v103_v33, %v85_v20  ;;  %v106_v39 = vadd.f32 %v104_v34, %v86_v2  ;;  %v114_v40 = vstv %s1028_s14  ;;  %v122_v41 = vstv %s1034_s15  ;;  %s1074_s22 = sld [smem:[#allocation2 + $0x14]] }
  0x1e   :  { %v111_v42 = vadd.f32 %v109_v12, %v91_v30  ;;  %v112_v43 = vadd.f32 %v110_v13, %v92_v32  ;;  %v115_v44 = vmul.f32 %v114_v40, %v954_v14  ;;  %v116_v45 = vmul.f32 %v114_v40, %v958_v15  ;;  %s1078_s23 = sld [smem:[#allocation2 + $0x39]] }
  0x1f   :  { %v123_v46 = vmul.f32 %v122_v41, %v964_v16  ;;  %v124_v47 = vmul.f32 %v122_v41, %v968_v17  ;;  %v128_v48 = vstv %s1038_s16  ;;  %v134_v49 = vstv %s1042_s17  ;;  %s1082_s24 = sld [smem:[#allocation2 + $0x3a]] }
  0x20   :  { %v117_v50 = vadd.f32 %v115_v44, %v97_v36  ;;  %v118_v51 = vadd.f32 %v116_v45, %v98_v37  ;;  %v129_v52 = vmul.f32 %v128_v48, %v964_v16  ;;  %v130_v14 = vmul.f32 %v128_v48, %v968_v17  ;;  %s1088_s25 = sld [smem:[#allocation2 + $0x3b]] }
  0x21   :  { %v125_v15 = vadd.f32 %v123_v46, %v105_v38  ;;  %v126_v53 = vadd.f32 %v124_v47, %v106_v39  ;;  %v135_v54 = vmul.f32 %v134_v49, %v964_v16  ;;  %v136_v55 = vmul.f32 %v134_v49, %v968_v17  ;;  %s1094_s26 = sld [smem:[#allocation2 + $0x3c]] }
  0x22   :  { %v131_v56 = vadd.f32 %v129_v52, %v111_v42  ;;  %v132_v57 = vadd.f32 %v130_v14, %v112_v43  ;;  %v142_v58 = vstv %s1048_s18  ;;  %v148_v59 = vstv %s1054_s0  ;;  %s1098_s27 = sld [smem:[#allocation2 + $0x3d]] }
  0x23   :  { %v137_v60 = vadd.f32 %v135_v54, %v117_v50  ;;  %v138_v61 = vadd.f32 %v136_v55, %v118_v51  ;;  %v143_v62 = vmul.f32 %v142_v58, %v972_v18  ;;  %v144_v63 = vmul.f32 %v142_v58, %v976_v19  ;;  %s1102_s28 = sld [smem:[#allocation2 + $0x3e]] }
  0x24   :  { %v149_v20 = vmul.f32 %v148_v59, %v972_v18  ;;  %v150_v16 = vmul.f32 %v148_v59, %v976_v19  ;;  %v154_v17 = vstv %s1058_s19  ;;  %v162_v2 = vstv %s1062_s20  ;;  %s1108_s29 = sld [smem:[#allocation2 + $0x3f]] }
  0x25   :  { %v145_v3 = vadd.f32 %v143_v62, %v125_v15  ;;  %v146_v21 = vadd.f32 %v144_v63, %v126_v53  ;;  %v155_v24 = vmul.f32 %v154_v17, %v972_v18  ;;  %v156_v25 = vmul.f32 %v154_v17, %v976_v19  ;;  %s1114_s30 = sld [smem:[#allocation2 + $0x40]] }
  0x26   :  { %v151_v28 = vadd.f32 %v149_v20, %v131_v56  ;;  %v152_v29 = vadd.f32 %v150_v16, %v132_v57  ;;  %v163_v30 = vmul.f32 %v162_v2, %v934_v10  ;;  %v164_v32 = vmul.f32 %v162_v2, %v938_v11  ;;  %s1120_s3 = sld [smem:[#allocation2 + $0x41]] }
  0x27   :  { %v157_v33 = vadd.f32 %v155_v24, %v137_v60  ;;  %v158_v34 = vadd.f32 %v156_v25, %v138_v61  ;;  %v168_v36 = vstv %s1068_s21  ;;  %v174_v37 = vstv %s1074_s22  ;;  %s1126_s4 = sld [smem:[#allocation2 + $0x15]] }
  0x28   :  { %v165_v12 = vadd.f32 %v163_v30, %v145_v3  ;;  %v166_v18 = vadd.f32 %v164_v32, %v146_v21  ;;  %v169_v19 = vmul.f32 %v168_v36, %v934_v10  ;;  %v170_v13 = vmul.f32 %v168_v36, %v938_v11  ;;  %s1132_s5 = sld [smem:[#allocation2 + $0x16]] }
  0x29   :  { %v175_v38 = vmul.f32 %v174_v37, %v934_v10  ;;  %v176_v39 = vmul.f32 %v174_v37, %v938_v11  ;;  %v182_v40 = vstv %s1078_s23  ;;  %v188_v41 = vstv %s1082_s24  ;;  %s1136_s6 = sld [smem:[#allocation2 + $0x17]] }
  0x2a   :  { %v171_v42 = vadd.f32 %v169_v19, %v151_v28  ;;  %v172_v43 = vadd.f32 %v170_v13, %v152_v29  ;;  %v183_v44 = vmul.f32 %v182_v40, %v984_v22  ;;  %v184_v45 = vmul.f32 %v182_v40, %v988_v23  ;;  %s1142_s7 = sld [smem:[#allocation2 + $0x42]] }
  0x2b   :  { %v177_v46 = vadd.f32 %v175_v38, %v157_v33  ;;  %v178_v47 = vadd.f32 %v176_v39, %v158_v34  ;;  %v189_v10 = vmul.f32 %v188_v41, %v984_v22  ;;  %v190_v48 = vmul.f32 %v188_v41, %v988_v23  ;;  %s1146_s8 = sld [smem:[#allocation2 + $0x43]] }
  0x2c   :  { %v185_v11 = vadd.f32 %v183_v44, %v165_v12  ;;  %v186_v49 = vadd.f32 %v184_v45, %v166_v18  ;;  %v194_v50 = vstv %s1088_s25  ;;  %v202_v51 = vstv %s1094_s26  ;;  %s1153_s9 = sld [smem:[#allocation2 + $0x44]] }
  0x2d   :  { %v191_v52 = vadd.f32 %v189_v10, %v171_v42  ;;  %v192_v14 = vadd.f32 %v190_v48, %v172_v43  ;;  %v195_v15 = vmul.f32 %v194_v50, %v984_v22  ;;  %v196_v53 = vmul.f32 %v194_v50, %v988_v23  ;;  %s1157_s10 = sld [smem:[#allocation2 + $0x45]] }
  0x2e   :  { %v203_v54 = vmul.f32 %v202_v51, %v995_v26  ;;  %v204_v55 = vmul.f32 %v202_v51, %v999_v27  ;;  %v208_v56 = vstv %s1098_s27  ;;  %v214_v57 = vstv %s1102_s28  ;;  %s1163_s11 = sld [smem:[#allocation2 + $0x46]] }
  0x2f   :  { %v197_v58 = vadd.f32 %v195_v15, %v177_v46  ;;  %v198_v59 = vadd.f32 %v196_v53, %v178_v47  ;;  %v209_v60 = vmul.f32 %v208_v56, %v995_v26  ;;  %v210_v22 = vmul.f32 %v208_v56, %v999_v27  ;;  %s1166_s12 = sld [smem:[#allocation2 + $0x47]] }
  0x30   :  { %v205_v23 = vadd.f32 %v203_v54, %v185_v11  ;;  %v206_v61 = vadd.f32 %v204_v55, %v186_v49  ;;  %v215_v62 = vmul.f32 %v214_v57, %v995_v26  ;;  %v216_v63 = vmul.f32 %v214_v57, %v999_v27  ;;  %s1169_s13 = sld [smem:[#allocation2 + $0x18]] }
  0x31   :  { %v211_v20 = vadd.f32 %v209_v60, %v191_v52  ;;  %v212_v16 = vadd.f32 %v210_v22, %v192_v14  ;;  %v222_v17 = vstv %s1108_s29  ;;  %v228_v2 = vstv %s1114_s30  ;;  %s1172_s14 = sld [smem:[#allocation2 + $0x19]] }
  0x32   :  { %v217_v3 = vadd.f32 %v215_v62, %v197_v58  ;;  %v218_v21 = vadd.f32 %v216_v63, %v198_v59  ;;  %v223_v24 = vmul.f32 %v222_v17, %v1007_v31  ;;  %v224_v25 = vmul.f32 %v222_v17, %v1016_v35  ;;  %s1176_s15 = sld [smem:[#allocation2 + $0x1a]] }
  0x33   :  { %v229_v28 = vmul.f32 %v228_v2, %v1007_v31  ;;  %v230_v26 = vmul.f32 %v228_v2, %v1016_v35  ;;  %v234_v27 = vstv %s1120_s3  ;;  %v239_v29 = vmul.f32 %v915_v6, %v881_v0  ;;  %s1182_s16 = sld [smem:[#allocation2 + $0x48]] }
  0x34   :  { %v225_v30 = vadd.f32 %v223_v24, %v205_v23  ;;  %v226_v32 = vadd.f32 %v224_v25, %v206_v61  ;;  %v235_v33 = vmul.f32 %v234_v27, %v1007_v31  ;;  %v236_v34 = vmul.f32 %v234_v27, %v1016_v35  ;;  %s1184_s17 = sld [smem:[#allocation2 + $0x49]] }
  0x35   :  { %v231_v36 = vadd.f32 %v229_v28, %v211_v20  ;;  %v232_v37 = vadd.f32 %v230_v26, %v212_v16  ;;  %v240_v12 = vmul.f32 %v920_v7, %v886_v1  ;;  %v242_v18 = vstv %s1126_s4  ;;  %s1186_s18 = sld [smem:[#allocation2 + $0x4a]] }
  0x36   :  { %v237_v19 = vadd.f32 %v235_v33, %v217_v3  ;;  %v238_v13 = vadd.f32 %v236_v34, %v218_v21  ;;  %v243_v38 = vmul.f32 %v242_v18, %v239_v29  ;;  %v248_v39 = vstv %s1132_s5  ;;  %s1194_s0 = sld [smem:[#allocation2 + $0x6]] }
  0x37   :  { %v244_v40 = vmul.f32 %v242_v18, %v240_v12  ;;  %v249_v41 = vmul.f32 %v248_v39, %v239_v29  ;;  %v250_v31 = vmul.f32 %v248_v39, %v240_v12  ;;  %v254_v35 = vstv %s1136_s6  ;;  %s1196_s19 = sld [smem:[#allocation2 + $0x7]] }
  0x38   :  { %v245_v42 = vadd.f32 %v243_v38, %v225_v30  ;;  %v255_v43 = vmul.f32 %v254_v35, %v239_v29  ;;  %v256_v44 = vmul.f32 %v254_v35, %v240_v12  ;;  %v259_v45 = vmul.f32 %v915_v6, %v239_v29  ;;  %s1202_s20 = sld [smem:[#allocation2 + $0x8]] }
  0x39   :  { %v246_v46 = vadd.f32 %v244_v40, %v226_v32  ;;  %v251_v47 = vadd.f32 %v249_v41, %v231_v36  ;;  %v252_v10 = vadd.f32 %v250_v31, %v232_v37  ;;  %v260_v48 = vmul.f32 %v920_v7, %v240_v12  ;;  %s1206_s21 = sld [smem:[#allocation2 + $0x1b]] }
  0x3a   :  { %v257_v11 = vadd.f32 %v255_v43, %v237_v19  ;;  %v258_v49 = vadd.f32 %v256_v44, %v238_v13  ;;  %v262_v50 = vstv %s1142_s7  ;;  %v268_v51 = vstv %s1146_s8  ;;  %s1208_s22 = sld [smem:[#allocation2 + $0x1c]] }
  0x3b   :  { %v263_v52 = vmul.f32 %v262_v50, %v259_v45  ;;  %v264_v14 = vmul.f32 %v262_v50, %v260_v48  ;;  %v269_v15 = vmul.f32 %v268_v51, %v259_v45  ;;  %v270_v53 = vmul.f32 %v268_v51, %v260_v48  ;;  %s1210_s23 = sld [smem:[#allocation2 + $0x1d]] }
  0x3c   :  { %v274_v54 = vstv %s1153_s9  ;;  %v279_v55 = vmul.f32 %v925_v8, %v239_v29  ;;  %v280_v56 = vmul.f32 %v930_v9, %v240_v12  ;;  %v282_v57 = vstv %s1157_s10  ;;  %s1218_s24 = sld [smem:[#allocation2 + $0x4b]] }
  0x3d   :  { %v265_v58 = vadd.f32 %v263_v52, %v245_v42  ;;  %v266_v59 = vadd.f32 %v264_v14, %v246_v46  ;;  %v271_v60 = vadd.f32 %v269_v15, %v251_v47  ;;  %v272_v22 = vadd.f32 %v270_v53, %v252_v10  ;;  %s1222_s25 = sld [smem:[#allocation2 + $0x4c]] }
  0x3e   :  { %v275_v23 = vmul.f32 %v274_v54, %v259_v45  ;;  %v276_v61 = vmul.f32 %v274_v54, %v260_v48  ;;  %v283_v62 = vmul.f32 %v282_v57, %v279_v55  ;;  %v284_v63 = vmul.f32 %v282_v57, %v280_v56  ;;  %s1224_s26 = sld [smem:[#allocation2 + $0x4d]] }
  0x3f   :  { %v288_v20 = vstv %s1163_s11  ;;  %v294_v16 = vstv %s1166_s12  ;;  %v299_v17 = vmul.f32 %v925_v8, %v881_v0  ;;  %v300_v2 = vmul.f32 %v930_v9, %v886_v1  ;;  %s1234_s27 = sld [smem:[#allocation2 + $0x4e]] }
  0x40   :  { %v277_v3 = vadd.f32 %v275_v23, %v257_v11  ;;  %v278_v21 = vadd.f32 %v276_v61, %v258_v49  ;;  %v285_v24 = vadd.f32 %v283_v62, %v265_v58  ;;  %v286_v25 = vadd.f32 %v284_v63, %v266_v59  ;;  %s1239_s28 = sld [smem:[#allocation2 + $0x4f]] }
  0x41   :  { %v289_v28 = vmul.f32 %v288_v20, %v279_v55  ;;  %v290_v26 = vmul.f32 %v288_v20, %v280_v56  ;;  %v295_v27 = vmul.f32 %v294_v16, %v279_v55  ;;  %v296_v29 = vmul.f32 %v294_v16, %v280_v56  ;;  %s1241_s29 = sld [smem:[#allocation2 + $0x50]] }
  0x42   :  { %v302_v30 = vstv %s1169_s13  ;;  %v308_v32 = vstv %s1172_s14  ;;  %v314_v33 = vstv %s1176_s15  ;;  %v319_v0 = vmul.f32 %v925_v8, %v299_v17  ;;  %s1245_s30 = sld [smem:[#allocation2 + $0x51]] }
  0x43   :  { %v291_v34 = vadd.f32 %v289_v28, %v271_v60  ;;  %v292_v1 = vadd.f32 %v290_v26, %v272_v22  ;;  %v297_v36 = vadd.f32 %v295_v27, %v277_v3  ;;  %v298_v37 = vadd.f32 %v296_v29, %v278_v21  ;;  %s1250_s3 = sld [smem:[#allocation2 + $0x52]] }
  0x44   :  { %v303_v12 = vmul.f32 %v302_v30, %v299_v17  ;;  %v304_v18 = vmul.f32 %v302_v30, %v300_v2  ;;  %v309_v19 = vmul.f32 %v308_v32, %v299_v17  ;;  %v310_v13 = vmul.f32 %v308_v32, %v300_v2  ;;  %s1252_s4 = sld [smem:[#allocation2 + $0x53]] }
  0x45   :  { %v315_v38 = vmul.f32 %v314_v33, %v299_v17  ;;  %v316_v39 = vmul.f32 %v314_v33, %v300_v2  ;;  %v320_v40 = vmul.f32 %v930_v9, %v300_v2  ;;  %v322_v41 = vstv %s1182_s16  ;;  %s1256_s5 = sld [smem:[#allocation2 + $0x1e]] }
  0x46   :  { %v305_v31 = vadd.f32 %v303_v12, %v285_v24  ;;  %v306_v35 = vadd.f32 %v304_v18, %v286_v25  ;;  %v311_v42 = vadd.f32 %v309_v19, %v291_v34  ;;  %v312_v43 = vadd.f32 %v310_v13, %v292_v1  ;;  %s1260_s6 = sld [smem:[#allocation2 + $0x1f]] }
  0x47   :  { %v317_v44 = vadd.f32 %v315_v38, %v297_v36  ;;  %v318_v45 = vadd.f32 %v316_v39, %v298_v37  ;;  %v323_v46 = vmul.f32 %v322_v41, %v319_v0  ;;  %v324_v47 = vmul.f32 %v322_v41, %v320_v40  ;;  %s1262_s7 = sld [smem:[#allocation2 + $0x20]] }
  0x48   :  { %v328_v10 = vstv %s1184_s17  ;;  %v334_v48 = vstv %s1186_s18  ;;  %v340_v11 = vstv %s1194_s0  ;;  %v346_v49 = vstv %s1196_s19  ;;  %s1267_s8 = sld [smem:[#allocation2 + $0x54]] }
  0x49   :  { %v325_v50 = vadd.f32 %v323_v46, %v305_v31  ;;  %v326_v51 = vadd.f32 %v324_v47, %v306_v35  ;;  %v329_v52 = vmul.f32 %v328_v10, %v319_v0  ;;  %v330_v14 = vmul.f32 %v328_v10, %v320_v40  ;;  %s1270_s9 = sld [smem:[#allocation2 + $0x55]] }
  0x4a   :  { %v335_v15 = vmul.f32 %v334_v48, %v319_v0  ;;  %v336_v53 = vmul.f32 %v334_v48, %v320_v40  ;;  %v341_v54 = vmul.f32 %v905_v4, %v340_v11  ;;  %v342_v55 = vmul.f32 %v910_v5, %v340_v11  ;;  %s1275_s10 = sld [smem:[#allocation2 + $0x56]] }
  0x4b   :  { %v331_v56 = vadd.f32 %v329_v52, %v311_v42  ;;  %v332_v57 = vadd.f32 %v330_v14, %v312_v43  ;;  %v347_v58 = vmul.f32 %v905_v4, %v346_v49  ;;  %v348_v59 = vmul.f32 %v910_v5, %v346_v49  ;;  %s1277_s11 = sld [smem:[#allocation2 + $0x57]] }
  0x4c   :  { %v337_v60 = vadd.f32 %v335_v15, %v317_v44  ;;  %v338_v22 = vadd.f32 %v336_v53, %v318_v45  ;;  %v343_v23 = vadd.f32 %v341_v54, %v325_v50  ;;  %v344_v61 = vadd.f32 %v342_v55, %v326_v51  ;;  %s1283_s12 = sld [smem:[#allocation2 + $0x58]] }
  0x4d   :  { %v349_v62 = vadd.f32 %v347_v58, %v331_v56  ;;  %v350_v63 = vadd.f32 %v348_v59, %v332_v57  ;;  %v352_v20 = vstv %s1202_s20  ;;  %v357_v16 = vmul.f32 %v905_v4, %v905_v4  ;;  %s1286_s13 = sld [smem:[#allocation2 + $0x59]] }
  0x4e   :  { %v353_v17 = vmul.f32 %v905_v4, %v352_v20  ;;  %v354_v2 = vmul.f32 %v910_v5, %v352_v20  ;;  %v358_v3 = vmul.f32 %v910_v5, %v910_v5  ;;  %v360_v21 = vstv %s1206_s21  ;;  %s1289_s14 = sld [smem:[#allocation2 + $0x21]] }
  0x4f   :  { %v361_v24 = vmul.f32 %v360_v21, %v357_v16  ;;  %v366_v25 = vstv %s1208_s22  ;;  %v372_v28 = vstv %s1210_s23  ;;  %v377_v26 = vmul.f32 %v905_v4, %v357_v16  ;;  %s1292_s15 = sld [smem:[#allocation2 + $0x22]] }
  0x50   :  { %v355_v27 = vadd.f32 %v353_v17, %v337_v60  ;;  %v356_v29 = vadd.f32 %v354_v2, %v338_v22  ;;  %v362_v30 = vmul.f32 %v360_v21, %v358_v3  ;;  %v367_v32 = vmul.f32 %v366_v25, %v357_v16  ;;  %s1296_s16 = sld [smem:[#allocation2 + $0x23]] }
  0x51   :  { %v363_v33 = vadd.f32 %v361_v24, %v343_v23  ;;  %v368_v0 = vmul.f32 %v366_v25, %v358_v3  ;;  %v373_v34 = vmul.f32 %v372_v28, %v357_v16  ;;  %v374_v1 = vmul.f32 %v372_v28, %v358_v3  ;;  %s1302_s17 = sld [smem:[#allocation2 + $0x5a]] }
  0x52   :  { %v364_v36 = vadd.f32 %v362_v30, %v344_v61  ;;  %v369_v37 = vadd.f32 %v367_v32, %v349_v62  ;;  %v378_v12 = vmul.f32 %v910_v5, %v358_v3  ;;  %v380_v18 = vstv %s1218_s24  ;;  %s1304_s18 = sld [smem:[#allocation2 + $0x5b]] }
  0x53   :  { %v370_v19 = vadd.f32 %v368_v0, %v350_v63  ;;  %v375_v13 = vadd.f32 %v373_v34, %v355_v27  ;;  %v376_v38 = vadd.f32 %v374_v1, %v356_v29  ;;  %v381_v39 = vmul.f32 %v380_v18, %v377_v26  ;;  %s1306_s0 = sld [smem:[#allocation2 + $0x5c]] }
  0x54   :  { %v382_v40 = vmul.f32 %v380_v18, %v378_v12  ;;  %v386_v41 = vstv %s1222_s25  ;;  %v392_v31 = vstv %s1224_s26  ;;  %v397_v35 = vmul.f32 %v915_v6, %v357_v16  ;;  %s1314_s19 = sld [smem:[#allocation2 + $0x9]] }
  0x55   :  { %v383_v42 = vadd.f32 %v381_v39, %v363_v33  ;;  %v387_v43 = vmul.f32 %v386_v41, %v377_v26  ;;  %v388_v44 = vmul.f32 %v386_v41, %v378_v12  ;;  %v393_v45 = vmul.f32 %v392_v31, %v377_v26  ;;  %s1316_s20 = sld [smem:[#allocation2 + $0xa]] }
  0x56   :  { %v384_v46 = vadd.f32 %v382_v40, %v364_v36  ;;  %v394_v47 = vmul.f32 %v392_v31, %v378_v12  ;;  %v398_v10 = vmul.f32 %v920_v7, %v358_v3  ;;  %v400_v48 = vstv %s1234_s27  ;;  %s1322_s21 = sld [smem:[#allocation2 + $0xb]] }
  0x57   :  { %v389_v11 = vadd.f32 %v387_v43, %v369_v37  ;;  %v390_v49 = vadd.f32 %v388_v44, %v370_v19  ;;  %v395_v50 = vadd.f32 %v393_v45, %v375_v13  ;;  %v401_v51 = vmul.f32 %v400_v48, %v397_v35  ;;  %s1326_s22 = sld [smem:[#allocation2 + $0x24]] }
  0x58   :  { %v396_v52 = vadd.f32 %v394_v47, %v376_v38  ;;  %v402_v14 = vmul.f32 %v400_v48, %v398_v10  ;;  %v406_v15 = vstv %s1239_s28  ;;  %v412_v53 = vstv %s1241_s29  ;;  %s1328_s23 = sld [smem:[#allocation2 + $0x25]] }
  0x59   :  { %v403_v54 = vadd.f32 %v401_v51, %v383_v42  ;;  %v407_v55 = vmul.f32 %v406_v15, %v397_v35  ;;  %v408_v56 = vmul.f32 %v406_v15, %v398_v10  ;;  %v413_v57 = vmul.f32 %v412_v53, %v397_v35  ;;  %s1330_s24 = sld [smem:[#allocation2 + $0x26]] }
  0x5a   :  { %v404_v58 = vadd.f32 %v402_v14, %v384_v46  ;;  %v414_v59 = vmul.f32 %v412_v53, %v398_v10  ;;  %v417_v60 = vmul.f32 %v925_v8, %v357_v16  ;;  %v418_v22 = vmul.f32 %v930_v9, %v358_v3  ;;  %s1338_s25 = sld [smem:[#allocation2 + $0x5d]] }
  0x5b   :  { %v409_v23 = vadd.f32 %v407_v55, %v389_v11  ;;  %v410_v61 = vadd.f32 %v408_v56, %v390_v49  ;;  %v415_v62 = vadd.f32 %v413_v57, %v395_v50  ;;  %v420_v63 = vstv %s1245_s30  ;;  %s1342_s26 = sld [smem:[#allocation2 + $0x5e]] }
  0x5c   :  { %v416_v20 = vadd.f32 %v414_v59, %v396_v52  ;;  %v421_v17 = vmul.f32 %v420_v63, %v417_v60  ;;  %v422_v2 = vmul.f32 %v420_v63, %v418_v22  ;;  %v426_v21 = vstv %s1250_s3  ;;  %s1344_s27 = sld [smem:[#allocation2 + $0x5f]] }
  0x5d   :  { %v427_v24 = vmul.f32 %v426_v21, %v417_v60  ;;  %v428_v25 = vmul.f32 %v426_v21, %v418_v22  ;;  %v432_v28 = vstv %s1252_s4  ;;  %v437_v16 = vmul.f32 %v915_v6, %v905_v4  ;;  %s1359_s4 = sld [smem:[#allocation2 + $0x60]] }
  0x5e   :  { %v423_v3 = vadd.f32 %v421_v17, %v403_v54  ;;  %v424_v26 = vadd.f32 %v422_v2, %v404_v58  ;;  %v433_v27 = vmul.f32 %v432_v28, %v417_v60  ;;  %v434_v29 = vmul.f32 %v432_v28, %v418_v22 }
  0x5f   :  { %v429_v30 = vadd.f32 %v427_v24, %v409_v23  ;;  %v430_v32 = vadd.f32 %v428_v25, %v410_v61  ;;  %v438_v33 = vmul.f32 %v920_v7, %v910_v5  ;;  %v440_v0 = vstv %s1256_s5  ;;  %s1364_s5 = sld [smem:[#allocation2 + $0x61]] }
  0x60   :  { %v435_v34 = vadd.f32 %v433_v27, %v415_v62  ;;  %v436_v1 = vadd.f32 %v434_v29, %v416_v20  ;;  %v441_v36 = vmul.f32 %v440_v0, %v437_v16  ;;  %v446_v37 = vstv %s1260_s6  ;;  %s1366_s6 = sld [smem:[#allocation2 + $0x62]] }
  0x61   :  { %v442_v12 = vmul.f32 %v440_v0, %v438_v33  ;;  %v447_v18 = vmul.f32 %v446_v37, %v437_v16  ;;  %v448_v19 = vmul.f32 %v446_v37, %v438_v33  ;;  %v452_v13 = vstv %s1262_s7  ;;  %s1369_s7 = sld [smem:[#allocation2 + $0x27]] }
  0x62   :  { %v443_v38 = vadd.f32 %v441_v36, %v423_v3  ;;  %v453_v39 = vmul.f32 %v452_v13, %v437_v16  ;;  %v454_v40 = vmul.f32 %v452_v13, %v438_v33  ;;  %v457_v41 = vmul.f32 %v915_v6, %v437_v16 }
  0x63   :  { %v444_v31 = vadd.f32 %v442_v12, %v424_v26  ;;  %v449_v35 = vadd.f32 %v447_v18, %v429_v30  ;;  %v450_v42 = vadd.f32 %v448_v19, %v430_v32  ;;  %v458_v43 = vmul.f32 %v920_v7, %v438_v33 }
  0x64   :  { %v455_v44 = vadd.f32 %v453_v39, %v435_v34  ;;  %v456_v45 = vadd.f32 %v454_v40, %v436_v1  ;;  %v460_v46 = vstv %s1267_s8  ;;  %v466_v47 = vstv %s1270_s9 }
  0x65   :  { %v461_v10 = vmul.f32 %v460_v46, %v457_v41  ;;  %v462_v48 = vmul.f32 %v460_v46, %v458_v43  ;;  %v467_v11 = vmul.f32 %v466_v47, %v457_v41  ;;  %v468_v49 = vmul.f32 %v466_v47, %v458_v43 }
  0x66   :  { %v472_v50 = vstv %s1275_s10  ;;  %v477_v51 = vmul.f32 %v925_v8, %v437_v16  ;;  %v478_v52 = vmul.f32 %v930_v9, %v438_v33  ;;  %v480_v14 = vstv %s1277_s11  ;;  %s1379_s10 = sld [smem:[#allocation2 + $0x28]] }
  0x67   :  { %v463_v15 = vadd.f32 %v461_v10, %v443_v38  ;;  %v464_v53 = vadd.f32 %v462_v48, %v444_v31  ;;  %v469_v54 = vadd.f32 %v467_v11, %v449_v35  ;;  %v470_v55 = vadd.f32 %v468_v49, %v450_v42  ;;  %s1381_s11 = sld [smem:[#allocation2 + $0x29]] }
  0x68   :  { %v473_v56 = vmul.f32 %v472_v50, %v457_v41  ;;  %v474_v57 = vmul.f32 %v472_v50, %v458_v43  ;;  %v481_v58 = vmul.f32 %v480_v14, %v477_v51  ;;  %v482_v59 = vmul.f32 %v480_v14, %v478_v52 }
  0x69   :  { %v486_v60 = vstv %s1283_s12  ;;  %v492_v22 = vstv %s1286_s13  ;;  %v497_v23 = vmul.f32 %v925_v8, %v905_v4  ;;  %v498_v61 = vmul.f32 %v930_v9, %v910_v5 }
  0x6a   :  { %v475_v62 = vadd.f32 %v473_v56, %v455_v44  ;;  %v476_v63 = vadd.f32 %v474_v57, %v456_v45  ;;  %v483_v20 = vadd.f32 %v481_v58, %v463_v15  ;;  %v484_v17 = vadd.f32 %v482_v59, %v464_v53  ;;  %v842_v58 = vld [vmem:[%s1467_s1 + $0x28] sm:$0xff] }
  0x6b   :  { %v487_v2 = vmul.f32 %v486_v60, %v477_v51  ;;  %v488_v21 = vmul.f32 %v486_v60, %v478_v52  ;;  %v493_v24 = vmul.f32 %v492_v22, %v477_v51  ;;  %v494_v25 = vmul.f32 %v492_v22, %v478_v52 }
  0x6c   :  { %v500_v28 = vstv %s1289_s14  ;;  %v506_v16 = vstv %s1292_s15  ;;  %v512_v3 = vstv %s1296_s16  ;;  %v517_v4 = vmul.f32 %v925_v8, %v497_v23  ;;  %s1390_s14 = sld [smem:[#allocation2 + $0x63]] }
  0x6d   :  { %v489_v26 = vadd.f32 %v487_v2, %v469_v54  ;;  %v490_v5 = vadd.f32 %v488_v21, %v470_v55  ;;  %v495_v27 = vadd.f32 %v493_v24, %v475_v62  ;;  %v496_v29 = vadd.f32 %v494_v25, %v476_v63  ;;  %s1394_s15 = sld [smem:[#allocation2 + $0x64]] }
  0x6e   :  { %v501_v30 = vmul.f32 %v500_v28, %v497_v23  ;;  %v502_v32 = vmul.f32 %v500_v28, %v498_v61  ;;  %v507_v33 = vmul.f32 %v506_v16, %v497_v23  ;;  %v508_v0 = vmul.f32 %v506_v16, %v498_v61  ;;  %s1401_s16 = sld [smem:[#allocation2 + $0xc]] }
  0x6f   :  { %v513_v34 = vmul.f32 %v512_v3, %v497_v23  ;;  %v514_v1 = vmul.f32 %v512_v3, %v498_v61  ;;  %v518_v36 = vmul.f32 %v930_v9, %v498_v61  ;;  %v520_v37 = vstv %s1302_s17  ;;  %s1405_s17 = sld [smem:[#allocation2 + $0xd]] }
  0x70   :  { %v503_v8 = vadd.f32 %v501_v30, %v483_v20  ;;  %v504_v12 = vadd.f32 %v502_v32, %v484_v17  ;;  %v509_v18 = vadd.f32 %v507_v33, %v489_v26  ;;  %v510_v19 = vadd.f32 %v508_v0, %v490_v5 }
  0x71   :  { %v515_v13 = vadd.f32 %v513_v34, %v495_v27  ;;  %v516_v38 = vadd.f32 %v514_v1, %v496_v29  ;;  %v521_v39 = vmul.f32 %v520_v37, %v517_v4  ;;  %v522_v40 = vmul.f32 %v520_v37, %v518_v36  ;;  %v1376_v1 = vld [vmem:[%s1467_s1 + $0x30] sm:$0xff] }
  0x72   :  { %v526_v41 = vstv %s1304_s18  ;;  %v532_v31 = vstv %s1306_s0  ;;  %v538_v35 = vstv %s1314_s19  ;;  %v544_v9 = vstv %s1316_s20  ;;  %s1409_s18 = sld [smem:[#allocation2 + $0xe]] }
  0x73   :  { %v523_v42 = vadd.f32 %v521_v39, %v503_v8  ;;  %v524_v43 = vadd.f32 %v522_v40, %v504_v12  ;;  %v527_v44 = vmul.f32 %v526_v41, %v517_v4  ;;  %v528_v45 = vmul.f32 %v526_v41, %v518_v36  ;;  %s1413_s0 = sld [smem:[#allocation2 + $0x2a]] }
  0x74   :  { %v533_v46 = vmul.f32 %v532_v31, %v517_v4  ;;  %v534_v47 = vmul.f32 %v532_v31, %v518_v36  ;;  %v539_v10 = vmul.f32 %v915_v6, %v538_v35  ;;  %v540_v48 = vmul.f32 %v920_v7, %v538_v35  ;;  %s1416_s19 = sld [smem:[#allocation2 + $0x2b]] }
  0x75   :  { %v529_v11 = vadd.f32 %v527_v44, %v509_v18  ;;  %v530_v49 = vadd.f32 %v528_v45, %v510_v19  ;;  %v545_v50 = vmul.f32 %v915_v6, %v544_v9  ;;  %v546_v51 = vmul.f32 %v920_v7, %v544_v9  ;;  %v1350_v6 = vld [vmem:[%s1467_s1 + $0x20] sm:$0xff]  ;;  %s1419_s20 = sld [smem:[#allocation2 + $0x2c]] }
  0x76   :  { %v535_v52 = vadd.f32 %v533_v46, %v515_v13  ;;  %v536_v14 = vadd.f32 %v534_v47, %v516_v38  ;;  %v541_v15 = vadd.f32 %v539_v10, %v523_v42  ;;  %v542_v53 = vadd.f32 %v540_v48, %v524_v43  ;;  %v1386_v38 = vld [vmem:[%s1467_s1 + $0x38] sm:$0xff]  ;;  %s1396_s1 = sld [smem:[#allocation2 + $0x65]] }
  0x77   :  { %v547_v54 = vadd.f32 %v545_v50, %v529_v11  ;;  %v548_v55 = vadd.f32 %v546_v51, %v530_v49  ;;  %v550_v56 = vstv %s1322_s21  ;;  %v555_v7 = vmul.f32 %v1350_v6, %v1350_v6  ;;  %s1423_s21 = sld [smem:[#allocation2 + $0x66]] }
  0x78   :  { %v551_v57 = vmul.f32 %v1350_v6, %v550_v56  ;;  %v552_v59 = vmul.f32 %v842_v58, %v550_v56  ;;  %v556_v60 = vmul.f32 %v842_v58, %v842_v58  ;;  %v558_v22 = vstv %s1326_s22  ;;  %s1427_s22 = sld [smem:[#allocation2 + $0x67]] }
  0x79   :  { %v559_v23 = vmul.f32 %v558_v22, %v555_v7  ;;  %v564_v61 = vstv %s1328_s23  ;;  %v570_v62 = vstv %s1330_s24  ;;  %v575_v63 = vmul.f32 %v1350_v6, %v555_v7  ;;  %s1436_s23 = sld [smem:[#allocation2 + $0x68]] }
  0x7a   :  { %v553_v20 = vadd.f32 %v551_v57, %v535_v52  ;;  %v554_v17 = vadd.f32 %v552_v59, %v536_v14  ;;  %v560_v2 = vmul.f32 %v558_v22, %v556_v60  ;;  %v565_v21 = vmul.f32 %v564_v61, %v555_v7 }
  0x7b   :  { %v561_v24 = vadd.f32 %v559_v23, %v541_v15  ;;  %v566_v25 = vmul.f32 %v564_v61, %v556_v60  ;;  %v571_v28 = vmul.f32 %v570_v62, %v555_v7  ;;  %v572_v16 = vmul.f32 %v570_v62, %v556_v60 }
  0x7c   :  { %v562_v3 = vadd.f32 %v560_v2, %v542_v53  ;;  %v567_v4 = vadd.f32 %v565_v21, %v547_v54  ;;  %v576_v26 = vmul.f32 %v842_v58, %v556_v60  ;;  %v578_v5 = vstv %s1338_s25 }
  0x7d   :  { %v568_v27 = vadd.f32 %v566_v25, %v548_v55  ;;  %v573_v29 = vadd.f32 %v571_v28, %v553_v20  ;;  %v574_v30 = vadd.f32 %v572_v16, %v554_v17  ;;  %v579_v32 = vmul.f32 %v578_v5, %v575_v63 }
  0x7e   :  { %v580_v33 = vmul.f32 %v578_v5, %v576_v26  ;;  %v584_v0 = vstv %s1342_s26  ;;  %v590_v34 = vstv %s1344_s27  ;;  %v595_v36 = vmul.f32 %v1376_v1, %v555_v7 }
  0x7f   :  { %v581_v37 = vadd.f32 %v579_v32, %v561_v24  ;;  %v585_v8 = vmul.f32 %v584_v0, %v575_v63  ;;  %v586_v12 = vmul.f32 %v584_v0, %v576_v26  ;;  %v591_v18 = vmul.f32 %v590_v34, %v575_v63 }
  0x80   :  { %v582_v19 = vadd.f32 %v580_v33, %v562_v3  ;;  %v592_v13 = vmul.f32 %v590_v34, %v576_v26  ;;  %v596_v39 = vmul.f32 %v1386_v38, %v556_v60  ;;  %v598_v40 = vstv %s1359_s4 }
  0x81   :  { %v587_v41 = vadd.f32 %v585_v8, %v567_v4  ;;  %v588_v31 = vadd.f32 %v586_v12, %v568_v27  ;;  %v593_v35 = vadd.f32 %v591_v18, %v573_v29  ;;  %v599_v9 = vmul.f32 %v598_v40, %v595_v36 }
  0x82   :  { %v594_v42 = vadd.f32 %v592_v13, %v574_v30  ;;  %v600_v43 = vmul.f32 %v598_v40, %v596_v39  ;;  %v604_v44 = vstv %s1364_s5  ;;  %v610_v45 = vstv %s1366_s6 }
  0x83   :  { %v601_v46 = vadd.f32 %v599_v9, %v581_v37  ;;  %v605_v47 = vmul.f32 %v604_v44, %v595_v36  ;;  %v606_v10 = vmul.f32 %v604_v44, %v596_v39  ;;  %v611_v48 = vmul.f32 %v610_v45, %v595_v36 }
  0x84   :  { %v602_v11 = vadd.f32 %v600_v43, %v582_v19  ;;  %v612_v49 = vmul.f32 %v610_v45, %v596_v39  ;;  %v615_v50 = vmul.f32 %v1376_v1, %v1350_v6  ;;  %v616_v51 = vmul.f32 %v1386_v38, %v842_v58 }
  0x85   :  { %v607_v52 = vadd.f32 %v605_v47, %v587_v41  ;;  %v608_v14 = vadd.f32 %v606_v10, %v588_v31  ;;  %v613_v15 = vadd.f32 %v611_v48, %v593_v35  ;;  %v618_v53 = vstv %s1369_s7 }
  0x86   :  { %v614_v54 = vadd.f32 %v612_v49, %v594_v42  ;;  %v619_v55 = vmul.f32 %v618_v53, %v615_v50  ;;  %v620_v56 = vmul.f32 %v618_v53, %v616_v51  ;;  %v624_v7 = vstv %s1379_s10 }
  0x87   :  { %v625_v57 = vmul.f32 %v624_v7, %v615_v50  ;;  %v626_v59 = vmul.f32 %v624_v7, %v616_v51  ;;  %v630_v60 = vstv %s1381_s11  ;;  %v635_v6 = vmul.f32 %v1376_v1, %v615_v50 }
  0x88   :  { %v621_v58 = vadd.f32 %v619_v55, %v601_v46  ;;  %v622_v22 = vadd.f32 %v620_v56, %v602_v11  ;;  %v631_v23 = vmul.f32 %v630_v60, %v615_v50  ;;  %v632_v61 = vmul.f32 %v630_v60, %v616_v51 }
  0x89   :  { %v627_v62 = vadd.f32 %v625_v57, %v607_v52  ;;  %v628_v63 = vadd.f32 %v626_v59, %v608_v14  ;;  %v636_v20 = vmul.f32 %v1386_v38, %v616_v51  ;;  %v638_v17 = vstv %s1390_s14 }
  0x8a   :  { %v633_v2 = vadd.f32 %v631_v23, %v613_v15  ;;  %v634_v21 = vadd.f32 %v632_v61, %v614_v54  ;;  %v639_v24 = vmul.f32 %v638_v17, %v635_v6  ;;  %v644_v25 = vstv %s1394_s15 }
  0x8b   :  { %v640_v28 = vmul.f32 %v638_v17, %v636_v20  ;;  %v645_v16 = vmul.f32 %v644_v25, %v635_v6  ;;  %v646_v3 = vmul.f32 %v644_v25, %v636_v20  ;;  %v650_v4 = vstv %s1396_s1 }
  0x8c   :  { %v641_v26 = vadd.f32 %v639_v24, %v621_v58  ;;  %v651_v5 = vmul.f32 %v650_v4, %v635_v6  ;;  %v652_v27 = vmul.f32 %v650_v4, %v636_v20  ;;  %v656_v29 = vstv %s1401_s16 }
  0x8d   :  { %v642_v30 = vadd.f32 %v640_v28, %v622_v22  ;;  %v647_v32 = vadd.f32 %v645_v16, %v627_v62  ;;  %v657_v33 = vmul.f32 %v1376_v1, %v656_v29  ;;  %v648_v0 = vadd.f32 %v646_v3, %v628_v63 }
  0x8e   :  { %v653_v34 = vadd.f32 %v651_v5, %v633_v2  ;;  %v658_v36 = vmul.f32 %v1386_v38, %v656_v29  ;;  %v662_v37 = vstv %s1405_s17  ;;  %v654_v8 = vadd.f32 %v652_v27, %v634_v21 }
  0x8f   :  { %v663_v12 = vmul.f32 %v1376_v1, %v662_v37  ;;  %v664_v18 = vmul.f32 %v1386_v38, %v662_v37  ;;  %v668_v19 = vstv %s1409_s18  ;;  %v659_v13 = vadd.f32 %v657_v33, %v641_v26 }
  0x90   :  { %v669_v39 = vmul.f32 %v1376_v1, %v668_v19  ;;  %v670_v40 = vmul.f32 %v1386_v38, %v668_v19  ;;  %v673_v41 = vmul.f32 %v1376_v1, %v1376_v1  ;;  %v660_v31 = vadd.f32 %v658_v36, %v642_v30 }
  0x91   :  { %v665_v35 = vadd.f32 %v663_v12, %v647_v32  ;;  %v674_v9 = vmul.f32 %v1386_v38, %v1386_v38  ;;  %v676_v42 = vstv %s1413_s0  ;;  %v666_v43 = vadd.f32 %v664_v18, %v648_v0 }
  0x92   :  { %v671_v44 = vadd.f32 %v669_v39, %v653_v34  ;;  %v677_v45 = vmul.f32 %v676_v42, %v673_v41  ;;  %v682_v46 = vstv %s1416_s19  ;;  %v688_v11 = vstv %s1419_s20 }
  0x93   :  { %v678_v47 = vmul.f32 %v676_v42, %v674_v9  ;;  %v683_v10 = vmul.f32 %v682_v46, %v673_v41  ;;  %v684_v48 = vmul.f32 %v682_v46, %v674_v9  ;;  %v672_v49 = vadd.f32 %v670_v40, %v654_v8 }
  0x94   :  { %v689_v50 = vmul.f32 %v688_v11, %v673_v41  ;;  %v690_v51 = vmul.f32 %v688_v11, %v674_v9  ;;  %v693_v52 = vmul.f32 %v1376_v1, %v673_v41  ;;  %v679_v14 = vadd.f32 %v677_v45, %v659_v13 }
  0x95   :  { %v680_v15 = vadd.f32 %v678_v47, %v660_v31  ;;  %v685_v53 = vadd.f32 %v683_v10, %v665_v35  ;;  %v694_v54 = vmul.f32 %v1386_v38, %v674_v9  ;;  %v686_v55 = vadd.f32 %v684_v48, %v666_v43 }
  0x96   :  { %v696_v56 = vstv %s1423_s21  ;;  %v702_v7 = vstv %s1427_s22  ;;  %v691_v58 = vadd.f32 %v689_v50, %v671_v44  ;;  %v692_v22 = vadd.f32 %v690_v51, %v672_v49 }
  0x97   :  { %v697_v57 = vmul.f32 %v696_v56, %v693_v52  ;;  %v698_v59 = vmul.f32 %v696_v56, %v694_v54  ;;  %v703_v60 = vmul.f32 %v702_v7, %v693_v52  ;;  %v704_v6 = vmul.f32 %v702_v7, %v694_v54 }
  0x98   :  { %v708_v23 = vstv %s1436_s23 }
  0x99   :  { %v699_v61 = vadd.f32 %v697_v57, %v679_v14  ;;  %v700_v62 = vadd.f32 %v698_v59, %v680_v15  ;;  %v705_v63 = vadd.f32 %v703_v60, %v685_v53  ;;  %v706_v20 = vadd.f32 %v704_v6, %v686_v55 }
  0x9a   :  { %v709_v1 = vmul.f32 %v708_v23, %v693_v52  ;;  %v710_v17 = vmul.f32 %v708_v23, %v694_v54 }
  0x9b   :  { %713 = vst [vmem:[%s1468_s2] sm:$0xff] %v699_v61 }
  0x9c   :  { %v711_v38 = vadd.f32 %v709_v1, %v691_v58  ;;  %v712_v2 = vadd.f32 %v710_v17, %v692_v22  ;;  %714 = vst [vmem:[%s1468_s2 + $0x8] sm:$0xff] %v700_v62 }
  0x9d   :  { %836 = vst [vmem:[%s1468_s2 + $0x10] sm:$0xff] %v705_v63 }
  0x9e   :  { %837 = vst [vmem:[%s1468_s2 + $0x18] sm:$0xff] %v706_v20 }
  0x9f   :  { %838 = vst [vmem:[%s1468_s2 + $0x20] sm:$0xff] %v711_v38 }
  0xa0   :  { %839 = vst [vmem:[%s1468_s2 + $0x28] sm:$0xff] %v712_v2 }
  0xa1   :  { %725 = vsyncpa [#allocation3], 1 }

</bundles_post_ra>
